<compile_context>
chip_gen: v7x
topology: tpu7x:2x2x1
jax: 0.10.0
libtpu: 0.0.40
codegen_flags: <defaults>
</compile_context>

<pallas_src>
import jax
import jax.numpy as jnp
from jax import lax
from jax.experimental import pallas as pl
from jax.experimental.pallas import tpu as pltpu

_BN_EPS = 1e-5


# ---------------------------------------------------------------------------
# Fused kernel
# ---------------------------------------------------------------------------

def _make_kernel(n_input, nz, n_hidden):
    H = n_hidden

    def kernel(xin_ref, sq_ref, odd_ref, vec_ref, out_ref):
        V = vec_ref[...]                      # (32, H) bias/gamma/beta slab

        def vrow(i):                          # (1, H) parameter row, static i
            return V[i:i + 1, :]

        def dot(a, w):
            return jnp.dot(a, w, preferred_element_type=jnp.float32)

        def bn(y, gi, bi):
            # Training-mode BatchNorm1d: biased batch statistics over axis 0.
            m = jnp.mean(y, axis=0, keepdims=True)
            c = y - m
            v = jnp.mean(c * c, axis=0, keepdims=True)
            return c * lax.rsqrt(v + _BN_EPS) * vrow(gi) + vrow(bi)

        xin = xin_ref[...]                    # (B, H) = [x | eps | 0]

        # ---------------- encoder ----------------
        # Layer 0: Linear -> ReLU -> BN.  enc0 weight is row-padded with zeros,
        # so the eps / zero lanes of xin contribute nothing.
        h = dot(xin, odd_ref[0]) + vrow(0)
        h = bn(jnp.maximum(h, 0.0), 1, 2)
        # Layers 1..3: Linear -> BN -> ReLU
        for li in range(3):
            h = dot(h, sq_ref[li]) + vrow(3 + 3 * li)
            h = jnp.maximum(bn(h, 4 + 3 * li, 5 + 3 * li), 0.0)
        # Layer 4: plain Linear
        h = dot(h, sq_ref[3]) + vrow(12)

        # ------------- fused fc1|fc2 heads -------------
        head = dot(h, odd_ref[1]) + vrow(13)  # (B, H): [mu | logvar | 0 ...]
        mu = head[:, :nz]
        logvar = head[:, nz:2 * nz]

        # ------------- reparametrize: z = eps*exp(0.5*logvar) + mu -------------
        eps = xin[:, n_input:n_input + nz]
        z = eps * jnp.exp(0.5 * logvar) + mu  # (B, nz)

        # ---------------- decoder ----------------
        dec0_w = odd_ref[2][:nz, :]           # (nz, H) static slice
        h = dot(z, dec0_w) + vrow(14)
        h = bn(jnp.maximum(h, 0.0), 15, 16)
        for li in range(3):
            h = dot(h, sq_ref[4 + li]) + vrow(17 + 3 * li)
            h = jnp.maximum(bn(h, 18 + 3 * li, 19 + 3 * li), 0.0)
        res_pad = dot(h, odd_ref[3]) + vrow(26)   # res in lanes [0, n_input)
        res = res_pad[:, :n_input]

        # ---- single lane-dense packed output: [res | z | mu | logvar | 0] ----
        pieces = [res, z, mu, logvar]
        pad_w = H - (n_input + 3 * nz)
        if pad_w > 0:
            pieces.append(jnp.zeros((res.shape[0], pad_w), jnp.float32))
        out_ref[...] = jnp.concatenate(pieces, axis=-1)

    return kernel


# ---------------------------------------------------------------------------
# Wrapper: pack input, one pallas_call, unpack output
# ---------------------------------------------------------------------------

def fc_vae_forward(packed_params, x, eps):
    """x: (B, n_input), eps: (B, nz).  Returns (res, z, mu, logvar)."""
    sq, odd, vec = packed_params
    B, n_input = x.shape
    nz = eps.shape[1]
    H = sq.shape[-1]
    assert n_input + 3 * nz <= H, "packed in/out layout needs n_input+3*nz <= n_hidden"

    # Lane-dense packed input: [x | eps | 0]  (single input DMA, unmasked load)
    parts = [x, eps]
    pad = H - n_input - nz
    if pad > 0:
        parts.append(jnp.zeros((B, pad), jnp.float32))
    xin = jnp.concatenate(parts, axis=-1)

    vmem = pl.BlockSpec(memory_space=pltpu.MemorySpace.VMEM)
    out = pl.pallas_call(
        _make_kernel(n_input, nz, H),
        out_shape=jax.ShapeDtypeStruct((B, H), jnp.float32),
        in_specs=[vmem, vmem, vmem, vmem],
        out_specs=vmem,
    )(xin, sq, odd, vec)

    res = out[:, :n_input]
    z = out[:, n_input:n_input + nz]
    mu = out[:, n_input + nz:n_input + 2 * nz]
    logvar = out[:, n_input + 2 * nz:n_input + 3 * nz]
    return res, z, mu, logvar


# ---------------------------------------------------------------------------
# Parameter construction (PyTorch-default init) + slab packing
# ---------------------------------------------------------------------------

def init_fc_vae_params(key, n_input, nz, n_hidden):
    """Unpacked params mirroring the PyTorch module (weights stored (in,out))."""
    keys = iter(jax.random.split(key, 12))   # 5 enc + fc1 + fc2 + 5 dec linears

    def lin(i_f, o_f):
        kw, kb = jax.random.split(next(keys))
        bound = 1.0 / float(i_f) ** 0.5
        w = jax.random.uniform(kw, (i_f, o_f), jnp.float32, -bound, bound)
        b = jax.random.uniform(kb, (o_f,), jnp.float32, -bound, bound)
        return w, b

    def bn_p(f):  # PyTorch BatchNorm1d affine init: gamma=1, beta=0
        return jnp.ones((f,), jnp.float32), jnp.zeros((f,), jnp.float32)

    def stack(dims):
        layers = []
        for li, (i_f, o_f) in enumerate(dims):
            w, b = lin(i_f, o_f)
            if li < 4:                       # first 4 layers carry a BatchNorm
                g, bt = bn_p(o_f)
                layers.append((w, b, g, bt))
            else:
                layers.append((w, b))
        return layers

    enc = stack([(n_input, n_hidden)] + [(n_hidden, n_hidden)] * 4)
    fc1 = lin(n_hidden, nz)
    fc2 = lin(n_hidden, nz)
    dec = stack([(nz, n_hidden)] + [(n_hidden, n_hidden)] * 3 +
                [(n_hidden, n_input)])
    return {"enc": enc, "fc1": fc1, "fc2": fc2, "dec": dec}


def pack_fc_vae_params(p, n_input, nz, n_hidden):
    """Pack all parameters into 3 lane-dense slabs consumed by the kernel."""
    H = n_hidden
    enc, dec = p["enc"], p["dec"]

    # Slab 1: the seven square (H, H) weights.
    sq = jnp.stack([enc[1][0], enc[2][0], enc[3][0], enc[4][0],
                    dec[1][0], dec[2][0], dec[3][0]])

    # Slab 2: odd-shaped weights zero-padded to (H, H).
    def pad_rows(w):
        return jnp.zeros((H, H), jnp.float32).at[: w.shape[0], :].set(w)

    def pad_cols(w):
        return jnp.zeros((H, H), jnp.float32).at[:, : w.shape[1]].set(w)

    fc12_w = jnp.concatenate([p["fc1"][0], p["fc2"][0]], axis=1)   # (H, 2nz)
    odd = jnp.stack([pad_rows(enc[0][0]), pad_cols(fc12_w),
                     pad_rows(dec[0][0]), pad_cols(dec[4][0])])

    # Slab 3: all biases / gammas / betas row-stacked, padded to 32 rows.
    def pad_vec(v):
        return jnp.zeros((H,), jnp.float32).at[: v.shape[0]].set(v)

    rows = []
    for (w, b, g, bt) in enc[:4]:
        rows += [b, g, bt]                       # rows 0..11
    rows.append(enc[4][1])                       # row 12
    rows.append(jnp.concatenate([p["fc1"][1], p["fc2"][1]]))   # row 13
    for (w, b, g, bt) in dec[:4]:
        rows += [b, g, bt]                       # rows 14..25
    rows.append(dec[4][1])                       # row 26
    rows = [pad_vec(r) for r in rows]
    n_rows = ((len(rows) + 7) // 8) * 8
    rows += [jnp.zeros((H,), jnp.float32)] * (n_rows - len(rows))
    vec = jnp.stack(rows)                        # (32, H)

    return sq, odd, vec


# ---------------------------------------------------------------------------
# Pure-JAX reference for correctness checking.
# ---------------------------------------------------------------------------

def reference_forward(p, x, eps):
    def bn(y, g, bt):
        m = jnp.mean(y, axis=0, keepdims=True)
        v = jnp.mean((y - m) ** 2, axis=0, keepdims=True)
        return (y - m) / jnp.sqrt(v + _BN_EPS) * g + bt

    def stack(h, layers):
        w, b, g, bt = layers[0]
        h = bn(jnp.maximum(h @ w + b, 0.0), g, bt)
        for (w, b, g, bt) in layers[1:4]:
            h = jnp.maximum(bn(h @ w + b, g, bt), 0.0)
        w, b = layers[4]
        return h @ w + b

    h = stack(x, p["enc"])
    mu = h @ p["fc1"][0] + p["fc1"][1]
    logvar = h @ p["fc2"][0] + p["fc2"][1]
    z = eps * jnp.exp(0.5 * logvar) + mu
    res = stack(z, p["dec"])
    return res, z, mu, logvar


if __name__ == "__main__":
    B, N_INPUT, NZ, N_HIDDEN = 8, 64, 16, 128

    key = jax.random.PRNGKey(0)
    k_param, k_x, k_eps = jax.random.split(key, 3)
    params = init_fc_vae_params(k_param, N_INPUT, NZ, N_HIDDEN)
    packed = pack_fc_vae_params(params, N_INPUT, NZ, N_HIDDEN)
    x = jax.random.normal(k_x, (B, N_INPUT), jnp.float32)
    eps = jax.random.normal(k_eps, (B, NZ), jnp.float32)

    fwd = jax.jit(fc_vae_forward)
    res, z, mu, logvar = fwd(packed, x, eps)
    jax.block_until_ready((res, z, mu, logvar))

    res_r, z_r, mu_r, logvar_r = reference_forward(params, x, eps)
    assert res.shape == (B, N_INPUT) and z.shape == (B, NZ)
    assert mu.shape == (B, NZ) and logvar.shape == (B, NZ)
    assert jnp.allclose(mu, mu_r, atol=2e-3, rtol=2e-3)
    assert jnp.allclose(logvar, logvar_r, atol=2e-3, rtol=2e-3)
    assert jnp.allclose(z, z_r, atol=2e-3, rtol=2e-3)
    assert jnp.allclose(res, res_r, atol=2e-3, rtol=2e-3)

    print("KERNEL_OK")
</pallas_src>

<mosaic_0001>
module attributes {stable_mosaic.version = 11 : i64} {
  func.func @kernel(%arg0: memref<8x128xf32, #tpu.memory_space<vmem>>, %arg1: memref<7x128x128xf32, #tpu.memory_space<vmem>>, %arg2: memref<4x128x128xf32, #tpu.memory_space<vmem>>, %arg3: memref<32x128xf32, #tpu.memory_space<vmem>>, %arg4: memref<8x128xf32, #tpu.memory_space<vmem>>) attributes {dimension_semantics = [], scalar_prefetch = 0 : i64, scratch_operands = 0 : i64, tpu.core_type = #tpu.core_type<tc>} {
    %c0 = arith.constant 0 : index
    %c0_0 = arith.constant 0 : index
    %0 = vector.load %arg3[%c0, %c0_0] : memref<32x128xf32, #tpu.memory_space<vmem>>, vector<32x128xf32>
    %c0_1 = arith.constant 0 : index
    %c0_2 = arith.constant 0 : index
    %1 = vector.load %arg0[%c0_1, %c0_2] : memref<8x128xf32, #tpu.memory_space<vmem>>, vector<8x128xf32>
    %c0_3 = arith.constant 0 : index
    %c0_4 = arith.constant 0 : index
    %c0_5 = arith.constant 0 : index
    %2 = vector.load %arg2[%c0_3, %c0_4, %c0_5] : memref<4x128x128xf32, #tpu.memory_space<vmem>>, vector<1x128x128xf32>
    %3 = vector.shape_cast %2 : vector<1x128x128xf32> to vector<128x128xf32>
    %cst = arith.constant dense<0.000000e+00> : vector<8x128xf32>
    %4 = tpu.matmul %1, %3, %cst {dimension_numbers = #tpu.dot_dimension_numbers<[1], [0], [0], [1], [0, 0, 1, 1], [], []>} : vector<8x128xf32>, vector<128x128xf32>, vector<8x128xf32> -> vector<8x128xf32>
    %5 = vector.extract_strided_slice %0 {offsets = [0, 0], sizes = [1, 128], strides = [1, 1]} : vector<32x128xf32> to vector<1x128xf32>
    %6 = vector.broadcast %5 : vector<1x128xf32> to vector<8x128xf32>
    %7 = arith.addf %4, %6 : vector<8x128xf32>
    %cst_6 = arith.constant 0.000000e+00 : f32
    %8 = vector.broadcast %cst_6 : f32 to vector<8x128xf32>
    %9 = arith.maximumf %7, %8 : vector<8x128xf32>
    %cst_7 = arith.constant dense<0.000000e+00> : vector<128xf32>
    %10 = vector.multi_reduction <add>, %9, %cst_7 [0] : vector<8x128xf32> to vector<128xf32>
    %11 = vector.shape_cast %10 : vector<128xf32> to vector<1x128xf32>
    %cst_8 = arith.constant 8.000000e+00 : f32
    %12 = vector.broadcast %cst_8 : f32 to vector<1x128xf32>
    %13 = arith.divf %11, %12 : vector<1x128xf32>
    %14 = vector.broadcast %13 : vector<1x128xf32> to vector<8x128xf32>
    %15 = arith.subf %9, %14 : vector<8x128xf32>
    %16 = arith.mulf %15, %15 : vector<8x128xf32>
    %cst_9 = arith.constant dense<0.000000e+00> : vector<128xf32>
    %17 = vector.multi_reduction <add>, %16, %cst_9 [0] : vector<8x128xf32> to vector<128xf32>
    %18 = vector.shape_cast %17 : vector<128xf32> to vector<1x128xf32>
    %cst_10 = arith.constant 8.000000e+00 : f32
    %19 = vector.broadcast %cst_10 : f32 to vector<1x128xf32>
    %20 = arith.divf %18, %19 : vector<1x128xf32>
    %cst_11 = arith.constant 9.99999974E-6 : f32
    %21 = vector.broadcast %cst_11 : f32 to vector<1x128xf32>
    %22 = arith.addf %20, %21 : vector<1x128xf32>
    %23 = math.rsqrt %22 : vector<1x128xf32>
    %24 = vector.broadcast %23 : vector<1x128xf32> to vector<8x128xf32>
    %25 = arith.mulf %15, %24 : vector<8x128xf32>
    %26 = vector.extract_strided_slice %0 {offsets = [1, 0], sizes = [1, 128], strides = [1, 1]} : vector<32x128xf32> to vector<1x128xf32>
    %27 = vector.broadcast %26 : vector<1x128xf32> to vector<8x128xf32>
    %28 = arith.mulf %25, %27 : vector<8x128xf32>
    %29 = vector.extract_strided_slice %0 {offsets = [2, 0], sizes = [1, 128], strides = [1, 1]} : vector<32x128xf32> to vector<1x128xf32>
    %30 = vector.broadcast %29 : vector<1x128xf32> to vector<8x128xf32>
    %31 = arith.addf %28, %30 : vector<8x128xf32>
    %c0_12 = arith.constant 0 : index
    %c0_13 = arith.constant 0 : index
    %c0_14 = arith.constant 0 : index
    %32 = vector.load %arg1[%c0_12, %c0_13, %c0_14] : memref<7x128x128xf32, #tpu.memory_space<vmem>>, vector<1x128x128xf32>
    %33 = vector.shape_cast %32 : vector<1x128x128xf32> to vector<128x128xf32>
    %cst_15 = arith.constant dense<0.000000e+00> : vector<8x128xf32>
    %34 = tpu.matmul %31, %33, %cst_15 {dimension_numbers = #tpu.dot_dimension_numbers<[1], [0], [0], [1], [0, 0, 1, 1], [], []>} : vector<8x128xf32>, vector<128x128xf32>, vector<8x128xf32> -> vector<8x128xf32>
    %35 = vector.extract_strided_slice %0 {offsets = [3, 0], sizes = [1, 128], strides = [1, 1]} : vector<32x128xf32> to vector<1x128xf32>
    %36 = vector.broadcast %35 : vector<1x128xf32> to vector<8x128xf32>
    %37 = arith.addf %34, %36 : vector<8x128xf32>
    %cst_16 = arith.constant dense<0.000000e+00> : vector<128xf32>
    %38 = vector.multi_reduction <add>, %37, %cst_16 [0] : vector<8x128xf32> to vector<128xf32>
    %39 = vector.shape_cast %38 : vector<128xf32> to vector<1x128xf32>
    %cst_17 = arith.constant 8.000000e+00 : f32
    %40 = vector.broadcast %cst_17 : f32 to vector<1x128xf32>
    %41 = arith.divf %39, %40 : vector<1x128xf32>
    %42 = vector.broadcast %41 : vector<1x128xf32> to vector<8x128xf32>
    %43 = arith.subf %37, %42 : vector<8x128xf32>
    %44 = arith.mulf %43, %43 : vector<8x128xf32>
    %cst_18 = arith.constant dense<0.000000e+00> : vector<128xf32>
    %45 = vector.multi_reduction <add>, %44, %cst_18 [0] : vector<8x128xf32> to vector<128xf32>
    %46 = vector.shape_cast %45 : vector<128xf32> to vector<1x128xf32>
    %cst_19 = arith.constant 8.000000e+00 : f32
    %47 = vector.broadcast %cst_19 : f32 to vector<1x128xf32>
    %48 = arith.divf %46, %47 : vector<1x128xf32>
    %cst_20 = arith.constant 9.99999974E-6 : f32
    %49 = vector.broadcast %cst_20 : f32 to vector<1x128xf32>
    %50 = arith.addf %48, %49 : vector<1x128xf32>
    %51 = math.rsqrt %50 : vector<1x128xf32>
    %52 = vector.broadcast %51 : vector<1x128xf32> to vector<8x128xf32>
    %53 = arith.mulf %43, %52 : vector<8x128xf32>
    %54 = vector.extract_strided_slice %0 {offsets = [4, 0], sizes = [1, 128], strides = [1, 1]} : vector<32x128xf32> to vector<1x128xf32>
    %55 = vector.broadcast %54 : vector<1x128xf32> to vector<8x128xf32>
    %56 = arith.mulf %53, %55 : vector<8x128xf32>
    %57 = vector.extract_strided_slice %0 {offsets = [5, 0], sizes = [1, 128], strides = [1, 1]} : vector<32x128xf32> to vector<1x128xf32>
    %58 = vector.broadcast %57 : vector<1x128xf32> to vector<8x128xf32>
    %59 = arith.addf %56, %58 : vector<8x128xf32>
    %cst_21 = arith.constant 0.000000e+00 : f32
    %60 = vector.broadcast %cst_21 : f32 to vector<8x128xf32>
    %61 = arith.maximumf %59, %60 : vector<8x128xf32>
    %c1 = arith.constant 1 : index
    %c0_22 = arith.constant 0 : index
    %c0_23 = arith.constant 0 : index
    %62 = vector.load %arg1[%c1, %c0_22, %c0_23] : memref<7x128x128xf32, #tpu.memory_space<vmem>>, vector<1x128x128xf32>
    %63 = vector.shape_cast %62 : vector<1x128x128xf32> to vector<128x128xf32>
    %cst_24 = arith.constant dense<0.000000e+00> : vector<8x128xf32>
    %64 = tpu.matmul %61, %63, %cst_24 {dimension_numbers = #tpu.dot_dimension_numbers<[1], [0], [0], [1], [0, 0, 1, 1], [], []>} : vector<8x128xf32>, vector<128x128xf32>, vector<8x128xf32> -> vector<8x128xf32>
    %65 = vector.extract_strided_slice %0 {offsets = [6, 0], sizes = [1, 128], strides = [1, 1]} : vector<32x128xf32> to vector<1x128xf32>
    %66 = vector.broadcast %65 : vector<1x128xf32> to vector<8x128xf32>
    %67 = arith.addf %64, %66 : vector<8x128xf32>
    %cst_25 = arith.constant dense<0.000000e+00> : vector<128xf32>
    %68 = vector.multi_reduction <add>, %67, %cst_25 [0] : vector<8x128xf32> to vector<128xf32>
    %69 = vector.shape_cast %68 : vector<128xf32> to vector<1x128xf32>
    %cst_26 = arith.constant 8.000000e+00 : f32
    %70 = vector.broadcast %cst_26 : f32 to vector<1x128xf32>
    %71 = arith.divf %69, %70 : vector<1x128xf32>
    %72 = vector.broadcast %71 : vector<1x128xf32> to vector<8x128xf32>
    %73 = arith.subf %67, %72 : vector<8x128xf32>
    %74 = arith.mulf %73, %73 : vector<8x128xf32>
    %cst_27 = arith.constant dense<0.000000e+00> : vector<128xf32>
    %75 = vector.multi_reduction <add>, %74, %cst_27 [0] : vector<8x128xf32> to vector<128xf32>
    %76 = vector.shape_cast %75 : vector<128xf32> to vector<1x128xf32>
    %cst_28 = arith.constant 8.000000e+00 : f32
    %77 = vector.broadcast %cst_28 : f32 to vector<1x128xf32>
    %78 = arith.divf %76, %77 : vector<1x128xf32>
    %cst_29 = arith.constant 9.99999974E-6 : f32
    %79 = vector.broadcast %cst_29 : f32 to vector<1x128xf32>
    %80 = arith.addf %78, %79 : vector<1x128xf32>
    %81 = math.rsqrt %80 : vector<1x128xf32>
    %82 = vector.broadcast %81 : vector<1x128xf32> to vector<8x128xf32>
    %83 = arith.mulf %73, %82 : vector<8x128xf32>
    %84 = vector.extract_strided_slice %0 {offsets = [7, 0], sizes = [1, 128], strides = [1, 1]} : vector<32x128xf32> to vector<1x128xf32>
    %85 = vector.broadcast %84 : vector<1x128xf32> to vector<8x128xf32>
    %86 = arith.mulf %83, %85 : vector<8x128xf32>
    %87 = vector.extract_strided_slice %0 {offsets = [8, 0], sizes = [1, 128], strides = [1, 1]} : vector<32x128xf32> to vector<1x128xf32>
    %88 = vector.broadcast %87 : vector<1x128xf32> to vector<8x128xf32>
    %89 = arith.addf %86, %88 : vector<8x128xf32>
    %cst_30 = arith.constant 0.000000e+00 : f32
    %90 = vector.broadcast %cst_30 : f32 to vector<8x128xf32>
    %91 = arith.maximumf %89, %90 : vector<8x128xf32>
    %c2 = arith.constant 2 : index
    %c0_31 = arith.constant 0 : index
    %c0_32 = arith.constant 0 : index
    %92 = vector.load %arg1[%c2, %c0_31, %c0_32] : memref<7x128x128xf32, #tpu.memory_space<vmem>>, vector<1x128x128xf32>
    %93 = vector.shape_cast %92 : vector<1x128x128xf32> to vector<128x128xf32>
    %cst_33 = arith.constant dense<0.000000e+00> : vector<8x128xf32>
    %94 = tpu.matmul %91, %93, %cst_33 {dimension_numbers = #tpu.dot_dimension_numbers<[1], [0], [0], [1], [0, 0, 1, 1], [], []>} : vector<8x128xf32>, vector<128x128xf32>, vector<8x128xf32> -> vector<8x128xf32>
    %95 = vector.extract_strided_slice %0 {offsets = [9, 0], sizes = [1, 128], strides = [1, 1]} : vector<32x128xf32> to vector<1x128xf32>
    %96 = vector.broadcast %95 : vector<1x128xf32> to vector<8x128xf32>
    %97 = arith.addf %94, %96 : vector<8x128xf32>
    %cst_34 = arith.constant dense<0.000000e+00> : vector<128xf32>
    %98 = vector.multi_reduction <add>, %97, %cst_34 [0] : vector<8x128xf32> to vector<128xf32>
    %99 = vector.shape_cast %98 : vector<128xf32> to vector<1x128xf32>
    %cst_35 = arith.constant 8.000000e+00 : f32
    %100 = vector.broadcast %cst_35 : f32 to vector<1x128xf32>
    %101 = arith.divf %99, %100 : vector<1x128xf32>
    %102 = vector.broadcast %101 : vector<1x128xf32> to vector<8x128xf32>
    %103 = arith.subf %97, %102 : vector<8x128xf32>
    %104 = arith.mulf %103, %103 : vector<8x128xf32>
    %cst_36 = arith.constant dense<0.000000e+00> : vector<128xf32>
    %105 = vector.multi_reduction <add>, %104, %cst_36 [0] : vector<8x128xf32> to vector<128xf32>
    %106 = vector.shape_cast %105 : vector<128xf32> to vector<1x128xf32>
    %cst_37 = arith.constant 8.000000e+00 : f32
    %107 = vector.broadcast %cst_37 : f32 to vector<1x128xf32>
    %108 = arith.divf %106, %107 : vector<1x128xf32>
    %cst_38 = arith.constant 9.99999974E-6 : f32
    %109 = vector.broadcast %cst_38 : f32 to vector<1x128xf32>
    %110 = arith.addf %108, %109 : vector<1x128xf32>
    %111 = math.rsqrt %110 : vector<1x128xf32>
    %112 = vector.broadcast %111 : vector<1x128xf32> to vector<8x128xf32>
    %113 = arith.mulf %103, %112 : vector<8x128xf32>
    %114 = vector.extract_strided_slice %0 {offsets = [10, 0], sizes = [1, 128], strides = [1, 1]} : vector<32x128xf32> to vector<1x128xf32>
    %115 = vector.broadcast %114 : vector<1x128xf32> to vector<8x128xf32>
    %116 = arith.mulf %113, %115 : vector<8x128xf32>
    %117 = vector.extract_strided_slice %0 {offsets = [11, 0], sizes = [1, 128], strides = [1, 1]} : vector<32x128xf32> to vector<1x128xf32>
    %118 = vector.broadcast %117 : vector<1x128xf32> to vector<8x128xf32>
    %119 = arith.addf %116, %118 : vector<8x128xf32>
    %cst_39 = arith.constant 0.000000e+00 : f32
    %120 = vector.broadcast %cst_39 : f32 to vector<8x128xf32>
    %121 = arith.maximumf %119, %120 : vector<8x128xf32>
    %c3 = arith.constant 3 : index
    %c0_40 = arith.constant 0 : index
    %c0_41 = arith.constant 0 : index
    %122 = vector.load %arg1[%c3, %c0_40, %c0_41] : memref<7x128x128xf32, #tpu.memory_space<vmem>>, vector<1x128x128xf32>
    %123 = vector.shape_cast %122 : vector<1x128x128xf32> to vector<128x128xf32>
    %cst_42 = arith.constant dense<0.000000e+00> : vector<8x128xf32>
    %124 = tpu.matmul %121, %123, %cst_42 {dimension_numbers = #tpu.dot_dimension_numbers<[1], [0], [0], [1], [0, 0, 1, 1], [], []>} : vector<8x128xf32>, vector<128x128xf32>, vector<8x128xf32> -> vector<8x128xf32>
    %125 = vector.extract_strided_slice %0 {offsets = [12, 0], sizes = [1, 128], strides = [1, 1]} : vector<32x128xf32> to vector<1x128xf32>
    %126 = vector.broadcast %125 : vector<1x128xf32> to vector<8x128xf32>
    %127 = arith.addf %124, %126 : vector<8x128xf32>
    %c1_43 = arith.constant 1 : index
    %c0_44 = arith.constant 0 : index
    %c0_45 = arith.constant 0 : index
    %128 = vector.load %arg2[%c1_43, %c0_44, %c0_45] : memref<4x128x128xf32, #tpu.memory_space<vmem>>, vector<1x128x128xf32>
    %129 = vector.shape_cast %128 : vector<1x128x128xf32> to vector<128x128xf32>
    %cst_46 = arith.constant dense<0.000000e+00> : vector<8x128xf32>
    %130 = tpu.matmul %127, %129, %cst_46 {dimension_numbers = #tpu.dot_dimension_numbers<[1], [0], [0], [1], [0, 0, 1, 1], [], []>} : vector<8x128xf32>, vector<128x128xf32>, vector<8x128xf32> -> vector<8x128xf32>
    %131 = vector.extract_strided_slice %0 {offsets = [13, 0], sizes = [1, 128], strides = [1, 1]} : vector<32x128xf32> to vector<1x128xf32>
    %132 = vector.broadcast %131 : vector<1x128xf32> to vector<8x128xf32>
    %133 = arith.addf %130, %132 : vector<8x128xf32>
    %134 = vector.extract_strided_slice %133 {offsets = [0, 0], sizes = [8, 16], strides = [1, 1]} : vector<8x128xf32> to vector<8x16xf32>
    %135 = vector.extract_strided_slice %133 {offsets = [0, 16], sizes = [8, 16], strides = [1, 1]} : vector<8x128xf32> to vector<8x16xf32>
    %136 = vector.extract_strided_slice %1 {offsets = [0, 64], sizes = [8, 16], strides = [1, 1]} : vector<8x128xf32> to vector<8x16xf32>
    %cst_47 = arith.constant 5.000000e-01 : f32
    %137 = vector.broadcast %cst_47 : f32 to vector<8x16xf32>
    %138 = arith.mulf %137, %135 : vector<8x16xf32>
    %139 = math.exp %138 : vector<8x16xf32>
    %140 = arith.mulf %136, %139 : vector<8x16xf32>
    %141 = arith.addf %140, %134 : vector<8x16xf32>
    %c2_48 = arith.constant 2 : index
    %c0_49 = arith.constant 0 : index
    %c0_50 = arith.constant 0 : index
    %142 = vector.load %arg2[%c2_48, %c0_49, %c0_50] : memref<4x128x128xf32, #tpu.memory_space<vmem>>, vector<1x128x128xf32>
    %143 = vector.shape_cast %142 : vector<1x128x128xf32> to vector<128x128xf32>
    %144 = vector.extract_strided_slice %143 {offsets = [0, 0], sizes = [16, 128], strides = [1, 1]} : vector<128x128xf32> to vector<16x128xf32>
    %cst_51 = arith.constant dense<0.000000e+00> : vector<8x128xf32>
    %145 = tpu.matmul %141, %144, %cst_51 {dimension_numbers = #tpu.dot_dimension_numbers<[1], [0], [0], [1], [0, 0, 1, 1], [], []>} : vector<8x16xf32>, vector<16x128xf32>, vector<8x128xf32> -> vector<8x128xf32>
    %146 = vector.extract_strided_slice %0 {offsets = [14, 0], sizes = [1, 128], strides = [1, 1]} : vector<32x128xf32> to vector<1x128xf32>
    %147 = vector.broadcast %146 : vector<1x128xf32> to vector<8x128xf32>
    %148 = arith.addf %145, %147 : vector<8x128xf32>
    %cst_52 = arith.constant 0.000000e+00 : f32
    %149 = vector.broadcast %cst_52 : f32 to vector<8x128xf32>
    %150 = arith.maximumf %148, %149 : vector<8x128xf32>
    %cst_53 = arith.constant dense<0.000000e+00> : vector<128xf32>
    %151 = vector.multi_reduction <add>, %150, %cst_53 [0] : vector<8x128xf32> to vector<128xf32>
    %152 = vector.shape_cast %151 : vector<128xf32> to vector<1x128xf32>
    %cst_54 = arith.constant 8.000000e+00 : f32
    %153 = vector.broadcast %cst_54 : f32 to vector<1x128xf32>
    %154 = arith.divf %152, %153 : vector<1x128xf32>
    %155 = vector.broadcast %154 : vector<1x128xf32> to vector<8x128xf32>
    %156 = arith.subf %150, %155 : vector<8x128xf32>
    %157 = arith.mulf %156, %156 : vector<8x128xf32>
    %cst_55 = arith.constant dense<0.000000e+00> : vector<128xf32>
    %158 = vector.multi_reduction <add>, %157, %cst_55 [0] : vector<8x128xf32> to vector<128xf32>
    %159 = vector.shape_cast %158 : vector<128xf32> to vector<1x128xf32>
    %cst_56 = arith.constant 8.000000e+00 : f32
    %160 = vector.broadcast %cst_56 : f32 to vector<1x128xf32>
    %161 = arith.divf %159, %160 : vector<1x128xf32>
    %cst_57 = arith.constant 9.99999974E-6 : f32
    %162 = vector.broadcast %cst_57 : f32 to vector<1x128xf32>
    %163 = arith.addf %161, %162 : vector<1x128xf32>
    %164 = math.rsqrt %163 : vector<1x128xf32>
    %165 = vector.broadcast %164 : vector<1x128xf32> to vector<8x128xf32>
    %166 = arith.mulf %156, %165 : vector<8x128xf32>
    %167 = vector.extract_strided_slice %0 {offsets = [15, 0], sizes = [1, 128], strides = [1, 1]} : vector<32x128xf32> to vector<1x128xf32>
    %168 = vector.broadcast %167 : vector<1x128xf32> to vector<8x128xf32>
    %169 = arith.mulf %166, %168 : vector<8x128xf32>
    %170 = vector.extract_strided_slice %0 {offsets = [16, 0], sizes = [1, 128], strides = [1, 1]} : vector<32x128xf32> to vector<1x128xf32>
    %171 = vector.broadcast %170 : vector<1x128xf32> to vector<8x128xf32>
    %172 = arith.addf %169, %171 : vector<8x128xf32>
    %c4 = arith.constant 4 : index
    %c0_58 = arith.constant 0 : index
    %c0_59 = arith.constant 0 : index
    %173 = vector.load %arg1[%c4, %c0_58, %c0_59] : memref<7x128x128xf32, #tpu.memory_space<vmem>>, vector<1x128x128xf32>
    %174 = vector.shape_cast %173 : vector<1x128x128xf32> to vector<128x128xf32>
    %cst_60 = arith.constant dense<0.000000e+00> : vector<8x128xf32>
    %175 = tpu.matmul %172, %174, %cst_60 {dimension_numbers = #tpu.dot_dimension_numbers<[1], [0], [0], [1], [0, 0, 1, 1], [], []>} : vector<8x128xf32>, vector<128x128xf32>, vector<8x128xf32> -> vector<8x128xf32>
    %176 = vector.extract_strided_slice %0 {offsets = [17, 0], sizes = [1, 128], strides = [1, 1]} : vector<32x128xf32> to vector<1x128xf32>
    %177 = vector.broadcast %176 : vector<1x128xf32> to vector<8x128xf32>
    %178 = arith.addf %175, %177 : vector<8x128xf32>
    %cst_61 = arith.constant dense<0.000000e+00> : vector<128xf32>
    %179 = vector.multi_reduction <add>, %178, %cst_61 [0] : vector<8x128xf32> to vector<128xf32>
    %180 = vector.shape_cast %179 : vector<128xf32> to vector<1x128xf32>
    %cst_62 = arith.constant 8.000000e+00 : f32
    %181 = vector.broadcast %cst_62 : f32 to vector<1x128xf32>
    %182 = arith.divf %180, %181 : vector<1x128xf32>
    %183 = vector.broadcast %182 : vector<1x128xf32> to vector<8x128xf32>
    %184 = arith.subf %178, %183 : vector<8x128xf32>
    %185 = arith.mulf %184, %184 : vector<8x128xf32>
    %cst_63 = arith.constant dense<0.000000e+00> : vector<128xf32>
    %186 = vector.multi_reduction <add>, %185, %cst_63 [0] : vector<8x128xf32> to vector<128xf32>
    %187 = vector.shape_cast %186 : vector<128xf32> to vector<1x128xf32>
    %cst_64 = arith.constant 8.000000e+00 : f32
    %188 = vector.broadcast %cst_64 : f32 to vector<1x128xf32>
    %189 = arith.divf %187, %188 : vector<1x128xf32>
    %cst_65 = arith.constant 9.99999974E-6 : f32
    %190 = vector.broadcast %cst_65 : f32 to vector<1x128xf32>
    %191 = arith.addf %189, %190 : vector<1x128xf32>
    %192 = math.rsqrt %191 : vector<1x128xf32>
    %193 = vector.broadcast %192 : vector<1x128xf32> to vector<8x128xf32>
    %194 = arith.mulf %184, %193 : vector<8x128xf32>
    %195 = vector.extract_strided_slice %0 {offsets = [18, 0], sizes = [1, 128], strides = [1, 1]} : vector<32x128xf32> to vector<1x128xf32>
    %196 = vector.broadcast %195 : vector<1x128xf32> to vector<8x128xf32>
    %197 = arith.mulf %194, %196 : vector<8x128xf32>
    %198 = vector.extract_strided_slice %0 {offsets = [19, 0], sizes = [1, 128], strides = [1, 1]} : vector<32x128xf32> to vector<1x128xf32>
    %199 = vector.broadcast %198 : vector<1x128xf32> to vector<8x128xf32>
    %200 = arith.addf %197, %199 : vector<8x128xf32>
    %cst_66 = arith.constant 0.000000e+00 : f32
    %201 = vector.broadcast %cst_66 : f32 to vector<8x128xf32>
    %202 = arith.maximumf %200, %201 : vector<8x128xf32>
    %c5 = arith.constant 5 : index
    %c0_67 = arith.constant 0 : index
    %c0_68 = arith.constant 0 : index
    %203 = vector.load %arg1[%c5, %c0_67, %c0_68] : memref<7x128x128xf32, #tpu.memory_space<vmem>>, vector<1x128x128xf32>
    %204 = vector.shape_cast %203 : vector<1x128x128xf32> to vector<128x128xf32>
    %cst_69 = arith.constant dense<0.000000e+00> : vector<8x128xf32>
    %205 = tpu.matmul %202, %204, %cst_69 {dimension_numbers = #tpu.dot_dimension_numbers<[1], [0], [0], [1], [0, 0, 1, 1], [], []>} : vector<8x128xf32>, vector<128x128xf32>, vector<8x128xf32> -> vector<8x128xf32>
    %206 = vector.extract_strided_slice %0 {offsets = [20, 0], sizes = [1, 128], strides = [1, 1]} : vector<32x128xf32> to vector<1x128xf32>
    %207 = vector.broadcast %206 : vector<1x128xf32> to vector<8x128xf32>
    %208 = arith.addf %205, %207 : vector<8x128xf32>
    %cst_70 = arith.constant dense<0.000000e+00> : vector<128xf32>
    %209 = vector.multi_reduction <add>, %208, %cst_70 [0] : vector<8x128xf32> to vector<128xf32>
    %210 = vector.shape_cast %209 : vector<128xf32> to vector<1x128xf32>
    %cst_71 = arith.constant 8.000000e+00 : f32
    %211 = vector.broadcast %cst_71 : f32 to vector<1x128xf32>
    %212 = arith.divf %210, %211 : vector<1x128xf32>
    %213 = vector.broadcast %212 : vector<1x128xf32> to vector<8x128xf32>
    %214 = arith.subf %208, %213 : vector<8x128xf32>
    %215 = arith.mulf %214, %214 : vector<8x128xf32>
    %cst_72 = arith.constant dense<0.000000e+00> : vector<128xf32>
    %216 = vector.multi_reduction <add>, %215, %cst_72 [0] : vector<8x128xf32> to vector<128xf32>
    %217 = vector.shape_cast %216 : vector<128xf32> to vector<1x128xf32>
    %cst_73 = arith.constant 8.000000e+00 : f32
    %218 = vector.broadcast %cst_73 : f32 to vector<1x128xf32>
    %219 = arith.divf %217, %218 : vector<1x128xf32>
    %cst_74 = arith.constant 9.99999974E-6 : f32
    %220 = vector.broadcast %cst_74 : f32 to vector<1x128xf32>
    %221 = arith.addf %219, %220 : vector<1x128xf32>
    %222 = math.rsqrt %221 : vector<1x128xf32>
    %223 = vector.broadcast %222 : vector<1x128xf32> to vector<8x128xf32>
    %224 = arith.mulf %214, %223 : vector<8x128xf32>
    %225 = vector.extract_strided_slice %0 {offsets = [21, 0], sizes = [1, 128], strides = [1, 1]} : vector<32x128xf32> to vector<1x128xf32>
    %226 = vector.broadcast %225 : vector<1x128xf32> to vector<8x128xf32>
    %227 = arith.mulf %224, %226 : vector<8x128xf32>
    %228 = vector.extract_strided_slice %0 {offsets = [22, 0], sizes = [1, 128], strides = [1, 1]} : vector<32x128xf32> to vector<1x128xf32>
    %229 = vector.broadcast %228 : vector<1x128xf32> to vector<8x128xf32>
    %230 = arith.addf %227, %229 : vector<8x128xf32>
    %cst_75 = arith.constant 0.000000e+00 : f32
    %231 = vector.broadcast %cst_75 : f32 to vector<8x128xf32>
    %232 = arith.maximumf %230, %231 : vector<8x128xf32>
    %c6 = arith.constant 6 : index
    %c0_76 = arith.constant 0 : index
    %c0_77 = arith.constant 0 : index
    %233 = vector.load %arg1[%c6, %c0_76, %c0_77] : memref<7x128x128xf32, #tpu.memory_space<vmem>>, vector<1x128x128xf32>
    %234 = vector.shape_cast %233 : vector<1x128x128xf32> to vector<128x128xf32>
    %cst_78 = arith.constant dense<0.000000e+00> : vector<8x128xf32>
    %235 = tpu.matmul %232, %234, %cst_78 {dimension_numbers = #tpu.dot_dimension_numbers<[1], [0], [0], [1], [0, 0, 1, 1], [], []>} : vector<8x128xf32>, vector<128x128xf32>, vector<8x128xf32> -> vector<8x128xf32>
    %236 = vector.extract_strided_slice %0 {offsets = [23, 0], sizes = [1, 128], strides = [1, 1]} : vector<32x128xf32> to vector<1x128xf32>
    %237 = vector.broadcast %236 : vector<1x128xf32> to vector<8x128xf32>
    %238 = arith.addf %235, %237 : vector<8x128xf32>
    %cst_79 = arith.constant dense<0.000000e+00> : vector<128xf32>
    %239 = vector.multi_reduction <add>, %238, %cst_79 [0] : vector<8x128xf32> to vector<128xf32>
    %240 = vector.shape_cast %239 : vector<128xf32> to vector<1x128xf32>
    %cst_80 = arith.constant 8.000000e+00 : f32
    %241 = vector.broadcast %cst_80 : f32 to vector<1x128xf32>
    %242 = arith.divf %240, %241 : vector<1x128xf32>
    %243 = vector.broadcast %242 : vector<1x128xf32> to vector<8x128xf32>
    %244 = arith.subf %238, %243 : vector<8x128xf32>
    %245 = arith.mulf %244, %244 : vector<8x128xf32>
    %cst_81 = arith.constant dense<0.000000e+00> : vector<128xf32>
    %246 = vector.multi_reduction <add>, %245, %cst_81 [0] : vector<8x128xf32> to vector<128xf32>
    %247 = vector.shape_cast %246 : vector<128xf32> to vector<1x128xf32>
    %cst_82 = arith.constant 8.000000e+00 : f32
    %248 = vector.broadcast %cst_82 : f32 to vector<1x128xf32>
    %249 = arith.divf %247, %248 : vector<1x128xf32>
    %cst_83 = arith.constant 9.99999974E-6 : f32
    %250 = vector.broadcast %cst_83 : f32 to vector<1x128xf32>
    %251 = arith.addf %249, %250 : vector<1x128xf32>
    %252 = math.rsqrt %251 : vector<1x128xf32>
    %253 = vector.broadcast %252 : vector<1x128xf32> to vector<8x128xf32>
    %254 = arith.mulf %244, %253 : vector<8x128xf32>
    %255 = vector.extract_strided_slice %0 {offsets = [24, 0], sizes = [1, 128], strides = [1, 1]} : vector<32x128xf32> to vector<1x128xf32>
    %256 = vector.broadcast %255 : vector<1x128xf32> to vector<8x128xf32>
    %257 = arith.mulf %254, %256 : vector<8x128xf32>
    %258 = vector.extract_strided_slice %0 {offsets = [25, 0], sizes = [1, 128], strides = [1, 1]} : vector<32x128xf32> to vector<1x128xf32>
    %259 = vector.broadcast %258 : vector<1x128xf32> to vector<8x128xf32>
    %260 = arith.addf %257, %259 : vector<8x128xf32>
    %cst_84 = arith.constant 0.000000e+00 : f32
    %261 = vector.broadcast %cst_84 : f32 to vector<8x128xf32>
    %262 = arith.maximumf %260, %261 : vector<8x128xf32>
    %c3_85 = arith.constant 3 : index
    %c0_86 = arith.constant 0 : index
    %c0_87 = arith.constant 0 : index
    %263 = vector.load %arg2[%c3_85, %c0_86, %c0_87] : memref<4x128x128xf32, #tpu.memory_space<vmem>>, vector<1x128x128xf32>
    %264 = vector.shape_cast %263 : vector<1x128x128xf32> to vector<128x128xf32>
    %cst_88 = arith.constant dense<0.000000e+00> : vector<8x128xf32>
    %265 = tpu.matmul %262, %264, %cst_88 {dimension_numbers = #tpu.dot_dimension_numbers<[1], [0], [0], [1], [0, 0, 1, 1], [], []>} : vector<8x128xf32>, vector<128x128xf32>, vector<8x128xf32> -> vector<8x128xf32>
    %266 = vector.extract_strided_slice %0 {offsets = [26, 0], sizes = [1, 128], strides = [1, 1]} : vector<32x128xf32> to vector<1x128xf32>
    %267 = vector.broadcast %266 : vector<1x128xf32> to vector<8x128xf32>
    %268 = arith.addf %265, %267 : vector<8x128xf32>
    %269 = vector.extract_strided_slice %268 {offsets = [0, 0], sizes = [8, 64], strides = [1, 1]} : vector<8x128xf32> to vector<8x64xf32>
    %cst_89 = arith.constant 0.000000e+00 : f32
    %270 = vector.broadcast %cst_89 : f32 to vector<8x16xf32>
    %271 = tpu.concatenate %269, %141, %134, %135, %270 in 1 : vector<8x64xf32>, vector<8x16xf32>, vector<8x16xf32>, vector<8x16xf32>, vector<8x16xf32> -> vector<8x128xf32>
    %c0_90 = arith.constant 0 : index
    %c0_91 = arith.constant 0 : index
    %272 = vector.load %arg4[%c0_90, %c0_91] : memref<8x128xf32, #tpu.memory_space<vmem>>, vector<8x128xf32>
    tpu.vector_store %arg4[%c0_90, %c0_91], %271 {strides = array<i32>} : memref<8x128xf32, #tpu.memory_space<vmem>>, vector<8x128xf32>,
    return
  }
}

</mosaic_0001>

<bundles_post_ra>
// kernel: fc_vae_forward.1
= control target key start
LH: loop header
LB: loop body
LE: loop exit
PB: predicated region body
PF: predicated region fallthrough
CT: control target
= control target key end

     0   :  { %9 = vsyncpa [#allocation3], 0  ;;  %s2434_s0 = inlined_call_operand.vmem [shape: f32[8,128], index: 0, kind: input, shape index: {}]   ;;  %s2435_s1 = inlined_call_operand.hbm [shape: f32[7,128,128], index: 1, kind: input, shape index: {}]   ;;  %s2436_s2 = inlined_call_operand.hbm [shape: f32[4,128,128], index: 2, kind: input, shape index: {}]   ;;  %s2437_s3 = inlined_call_operand.vmem [shape: f32[32,128], index: 3, kind: input, shape index: {}]   ;;  %s2438_s4 = inlined_call_operand.vmem [shape: f32[8,128], index: 4, kind: output, shape index: {}]  }
   0x1   :  { %10 = vsyncpa [#allocation5], 0  ;;  %s2163_s15 = smov [#allocation2]   ;;  %s2115_s19 = scalar_lea.hbm %s2435_s1, 14336 }
   0x2   :  { %s18_s16 = sshll.u32 %s2163_s15, 4  ;;  %p2116_p0 = scmp.ne.s32.totalorder %s2435_s1, %s2115_s19  ;;  %s19_s16 = int_to_ptr.vmem [resolvable:$true] %s18_s16 }
   0x3   :  { %p2119_p1 = scmp.lt.u32.totalorder %s2115_s19, %s2435_s1 }
   0x5   :  { %p2121_p2 = pnand %p2119_p1, %p2116_p0 }
   0x7   :  { %2124 = shalt.err (!%p2121_p2)
}
   0x8   :  { %s2125_s24 = scalar_lea.vmem %s19_s16, 14336  ;;  %p2130_p4 = scmp.lt.s32.totalorder %s19_s16, %s19_s16 }
   0x9   :  { %p2126_p3 = scmp.ne.s32.totalorder %s19_s16, %s2125_s24  ;;  %p2131_p5 = scmp.lt.s32.totalorder %s2125_s24, %s2125_s24 }
   0xb   :  { %p2132_p6 = por %p2131_p5, %p2130_p4 }
   0xd   :  { %p2133_p7 = pnand %p2132_p6, %p2126_p3 }
   0xf   :  { %2136 = shalt.err (!%p2133_p7)
}
  0x10   :  { %s2164_s25 = smov 128   ;;  %s2165_s26 = smov 8  }
  0x11   :  { %24 = dma.hbm_to_vmem [thread:$0]  %s2435_s1, 14336, %s19_s16, [#allocation3], %s2164_s25, %s2164_s25, %s2165_s26  }
  0x12   :  { %s2166_s29 = smov [#allocation4]   ;;  %s2137_s7 = scalar_lea.hbm %s2436_s2, 8192 }
  0x13   :  { %s30_s30 = sshll.u32 %s2166_s29, 4  ;;  %p2138_p8 = scmp.ne.s32.totalorder %s2436_s2, %s2137_s7  ;;  %s31_s30 = int_to_ptr.vmem [resolvable:$true] %s30_s30 }
  0x14   :  { %p2141_p9 = scmp.lt.u32.totalorder %s2137_s7, %s2436_s2 }
  0x16   :  { %p2143_p10 = pnand %p2141_p9, %p2138_p8 }
  0x18   :  { %2146 = shalt.err (!%p2143_p10)
}
  0x19   :  { %s2147_s12 = scalar_lea.vmem %s31_s30, 8192  ;;  %p2152_p12 = scmp.lt.s32.totalorder %s31_s30, %s31_s30 }
  0x1a   :  { %p2148_p11 = scmp.ne.s32.totalorder %s31_s30, %s2147_s12  ;;  %p2153_p13 = scmp.lt.s32.totalorder %s2147_s12, %s2147_s12 }
  0x1c   :  { %p2154_p0 = por %p2153_p13, %p2152_p12 }
  0x1e   :  { %p2155_p1 = pnand %p2154_p0, %p2148_p11 }
  0x20   :  { %2158 = shalt.err (!%p2155_p1)
}
  0x21   :  { %36 = dma.hbm_to_vmem [thread:$0]  %s2436_s2, 8192, %s31_s30, [#allocation5], %s2164_s25, %s2164_s25, %s2165_s26  }
  0x22   :  { %2159 = dma.done.wait [#allocation3], 14336  }
  0x23   :  { %2160 = vsyncadd [#allocation3], 4294952960 }
  0x24   :  { %2161 = dma.done.wait [#allocation5], 8192  }
  0x25   :  { %2162 = vsyncadd [#allocation5], 4294959104  ;;  %v2167_v0 = vmov 0.0|0.0   ;;  %vm2168_vm0 = vmmov 0   ;;  %v2169_v1 = vmov 0.0   ;;  %v50_v2 = vld [vmem:[#allocation4] sm:$0xff]  ;;  %v66_v51 = vlaneseq }
  0x26   :  { %1844 = vmatprep.subr.bf16.mxu0 %v2167_v0  ;;  %1519 = vmatprep.mubr.msk.f32.mxu0 %vm2168_vm0, %v2169_v1  ;;  %v51_v3 = vld [vmem:[#allocation4 + $0x8] sm:$0xff]  ;;  %v52_v4 = vld [vmem:[#allocation4 + $0x10] sm:$0xff]  ;;  %v53_v6 = vld [vmem:[#allocation4 + $0x18] sm:$0xff]  ;;  %s2170_s18 = smov 48   ;;  %s2171_s19 = smov 64   ;;  %vm738_vm1 = vcmask 130048  }
  0x27   :  { %1868 = vmatprep.subr.bf16.mxu1 %v2167_v0  ;;  %1554 = vmatprep.mubr.msk.f32.mxu1 %vm2168_vm0, %v2169_v1  ;;  %v1845_v5 = vpack.c.bf16 %v51_v3, %v50_v2  ;;  %v1848_v7 = vpack.c.bf16 %v53_v6, %v52_v4  ;;  %v54_v8 = vld [vmem:[#allocation4 + $0x20] sm:$0xff]  ;;  %v55_v9 = vld [vmem:[#allocation4 + $0x28] sm:$0xff]  ;;  %v56_v11 = vld [vmem:[#allocation4 + $0x30] sm:$0xff]  ;;  %v2252_v52 = vshrl.u32 %v66_v51, 7  ;;  %s2172_s20 = smov 80   ;;  %vm1298_vm2 = vcmask 523264  }
  0x28   :  { %v1851_v10 = vpack.c.bf16 %v55_v9, %v54_v8  ;;  %v57_v12 = vld [vmem:[#allocation4 + $0x38] sm:$0xff]  ;;  %v58_v14 = vld [vmem:[#allocation4 + $0x40] sm:$0xff]  ;;  %v59_v15 = vld [vmem:[#allocation4 + $0x48] sm:$0xff]  ;;  %vm1300_vm3 = vcmask 654336   ;;  %vm1302_vm4 = vcmask 785408   ;;  %vm1304_vm5 = vcmask 916480  }
  0x29   :  { %1846 = vmatpush3.bf16.msra.mxu0 %v1845_v5  ;;  %v1854_v13 = vpack.c.bf16 %v57_v12, %v56_v11  ;;  %v1857_v16 = vpack.c.bf16 %v59_v15, %v58_v14  ;;  %v60_v17 = vld [vmem:[#allocation4 + $0x50] sm:$0xff]  ;;  %v61_v18 = vld [vmem:[#allocation4 + $0x58] sm:$0xff]  ;;  %v62_v20 = vld [vmem:[#allocation4 + $0x60] sm:$0xff]  ;;  %v2255_v53 = vsub.s32 0, %v2252_v52  ;;  %v2265_v15 = vsub.s32 1, %v2252_v52 }
  0x2a   :  { %1847 = vmatprep.subr.bf16.mxu0 %v2167_v0  ;;  %v1860_v19 = vpack.c.bf16 %v61_v18, %v60_v17  ;;  %v63_v21 = vld [vmem:[#allocation4 + $0x68] sm:$0xff]  ;;  %v64_v23 = vld [vmem:[#allocation4 + $0x70] sm:$0xff]  ;;  %v65_v24 = vld [vmem:[#allocation4 + $0x78] sm:$0xff] }
  0x2b   :  { %v1863_v22 = vpack.c.bf16 %v63_v21, %v62_v20  ;;  %v1866_v25 = vpack.c.bf16 %v65_v24, %v64_v23  ;;  %v2238_v26 = vld [vmem:[%s2434_s0] sm:$0xff]  ;;  %v172_v28 = vld [vmem:[#allocation2 + $0x8] sm:$0xff]  ;;  %v173_v30 = vld [vmem:[#allocation2 + $0x10] sm:$0xff] }
  0x2c   :  { %v171_v27 = vld [vmem:[#allocation2] sm:$0xff]  ;;  %v174_v31 = vld [vmem:[#allocation2 + $0x18] sm:$0xff]  ;;  %v176_v34 = vld [vmem:[#allocation2 + $0x28] sm:$0xff] }
  0x2d   :  { %1849 = vmatpush3.bf16.msra.mxu0 %v1848_v7  ;;  %v1869_v29 = vpack.c.bf16 %v172_v28, %v171_v27  ;;  %v1872_v32 = vpack.c.bf16 %v174_v31, %v173_v30  ;;  %v175_v33 = vld [vmem:[#allocation2 + $0x20] sm:$0xff]  ;;  %v177_v36 = vld [vmem:[#allocation2 + $0x30] sm:$0xff]  ;;  %v178_v37 = vld [vmem:[#allocation2 + $0x38] sm:$0xff] }
  0x2e   :  { %1850 = vmatprep.subr.bf16.mxu0 %v2167_v0  ;;  %v1875_v35 = vpack.c.bf16 %v176_v34, %v175_v33  ;;  %v1878_v38 = vpack.c.bf16 %v178_v37, %v177_v36  ;;  %v179_v39 = vld [vmem:[#allocation2 + $0x40] sm:$0xff]  ;;  %v180_v40 = vld [vmem:[#allocation2 + $0x48] sm:$0xff]  ;;  %v181_v42 = vld [vmem:[#allocation2 + $0x50] sm:$0xff] }
  0x2f   :  { %1870 = vmatpush3.bf16.msra.mxu1 %v1869_v29  ;;  %v1881_v41 = vpack.c.bf16 %v180_v40, %v179_v39  ;;  %v182_v43 = vld [vmem:[#allocation2 + $0x58] sm:$0xff]  ;;  %v183_v45 = vld [vmem:[#allocation2 + $0x60] sm:$0xff]  ;;  %v184_v46 = vld [vmem:[#allocation2 + $0x68] sm:$0xff] }
  0x30   :  { %1871 = vmatprep.subr.bf16.mxu1 %v2167_v0  ;;  %v1884_v44 = vpack.c.bf16 %v182_v43, %v181_v42  ;;  %v1887_v47 = vpack.c.bf16 %v184_v46, %v183_v45  ;;  %v185_v48 = vld [vmem:[#allocation2 + $0x70] sm:$0xff]  ;;  %v186_v49 = vld [vmem:[#allocation2 + $0x78] sm:$0xff]  ;;  %v2260_v54 = vld [vmem:[%s2437_s3] sm:$0xff] }
  0x31   :  { %1852 = vmatpush3.bf16.msra.mxu0 %v1851_v10  ;;  %v1890_v50 = vpack.c.bf16 %v186_v49, %v185_v48  ;;  %v69_v55 = vrot.slane %v2260_v54, %v2255_v53  ;;  %v164_v17 = vrot.slane %v2260_v54, %v2265_v15  ;;  %v292_v23 = vld [vmem:[#allocation2 + $0x80] sm:$0xff]  ;;  %v293_v24 = vld [vmem:[#allocation2 + $0x88] sm:$0xff]  ;;  %v294_v27 = vld [vmem:[#allocation2 + $0x90] sm:$0xff]  ;;  %v2285_v48 = vsub.s32 3, %v2252_v52 }
  0x32   :  { %1853 = vmatprep.subr.bf16.mxu0 %v2167_v0  ;;  %v295_v28 = vld [vmem:[#allocation2 + $0x98] sm:$0xff]  ;;  %v296_v30 = vld [vmem:[#allocation2 + $0xa0] sm:$0xff]  ;;  %v297_v31 = vld [vmem:[#allocation2 + $0xa8] sm:$0xff] }
  0x33   :  { %1873 = vmatpush3.bf16.msra.mxu1 %v1872_v32  ;;  %v1896_v29 = vpack.c.bf16 %v295_v28, %v294_v27  ;;  %v1899_v32 = vpack.c.bf16 %v297_v31, %v296_v30  ;;  %v298_v33 = vld [vmem:[#allocation2 + $0xb0] sm:$0xff]  ;;  %v299_v34 = vld [vmem:[#allocation2 + $0xb8] sm:$0xff]  ;;  %v300_v36 = vld [vmem:[#allocation2 + $0xc0] sm:$0xff]  ;;  %v190_v49 = vrot.slane %v2260_v54, %v2285_v48 }
  0x34   :  { %1874 = vmatprep.subr.bf16.mxu1 %v2167_v0  ;;  %v301_v37 = vld [vmem:[#allocation2 + $0xc8] sm:$0xff]  ;;  %v302_v39 = vld [vmem:[#allocation2 + $0xd0] sm:$0xff]  ;;  %v303_v40 = vld [vmem:[#allocation2 + $0xd8] sm:$0xff] }
  0x35   :  { %1855 = vmatpush3.bf16.msra.mxu0 %v1854_v13  ;;  %v304_v42 = vld [vmem:[#allocation2 + $0xe0] sm:$0xff]  ;;  %v305_v43 = vld [vmem:[#allocation2 + $0xe8] sm:$0xff]  ;;  %v306_v45 = vld [vmem:[#allocation2 + $0xf0] sm:$0xff] }
  0x36   :  { %1856 = vmatprep.subr.bf16.mxu0 %v2167_v0  ;;  %v307_v46 = vld [vmem:[#allocation2 + $0xf8] sm:$0xff]  ;;  %v418_v30 = vld [vmem:[#allocation2 + $0x128] sm:$0xff] }
  0x37   :  { %1876 = vmatpush3.bf16.msra.mxu1 %v1875_v35  ;;  %v1902_v35 = vpack.c.bf16 %v299_v34, %v298_v33  ;;  %v416_v27 = vld [vmem:[#allocation2 + $0x118] sm:$0xff] }
  0x38   :  { %1877 = vmatprep.subr.bf16.mxu1 %v2167_v0  ;;  %v420_v33 = vld [vmem:[#allocation2 + $0x138] sm:$0xff] }
  0x39   :  { %1858 = vmatpush3.bf16.msra.mxu0 %v1857_v16  ;;  %v2268_v16 = vsub.s32 2, %v2252_v52 }
  0x3a   :  { %1859 = vmatprep.subr.bf16.mxu0 %v2167_v0 }
  0x3b   :  { %1879 = vmatpush3.bf16.msra.mxu1 %v1878_v38  ;;  %v169_v20 = vrot.slane %v2260_v54, %v2268_v16  ;;  %v1905_v38 = vpack.c.bf16 %v301_v37, %v300_v36  ;;  %v422_v36 = vld [vmem:[#allocation2 + $0x148] sm:$0xff] }
  0x3c   :  { %1880 = vmatprep.subr.bf16.mxu1 %v2167_v0 }
  0x3d   :  { %1861 = vmatpush3.bf16.msra.mxu0 %v1860_v19 }
  0x3e   :  { %1862 = vmatprep.subr.bf16.mxu0 %v2167_v0 }
  0x3f   :  { %1882 = vmatpush3.bf16.msra.mxu1 %v1881_v41  ;;  %v1908_v41 = vpack.c.bf16 %v303_v40, %v302_v39  ;;  %v424_v39 = vld [vmem:[#allocation2 + $0x158] sm:$0xff] }
  0x40   :  { %1883 = vmatprep.subr.bf16.mxu1 %v2167_v0 }
  0x41   :  { %1864 = vmatpush3.bf16.msra.mxu0 %v1863_v22 }
  0x42   :  { %1865 = vmatprep.subr.bf16.mxu0 %v2167_v0 }
  0x43   :  { %1885 = vmatpush3.bf16.msra.mxu1 %v1884_v44  ;;  %v1911_v44 = vpack.c.bf16 %v305_v43, %v304_v42  ;;  %v426_v42 = vld [vmem:[#allocation2 + $0x168] sm:$0xff] }
  0x44   :  { %1886 = vmatprep.subr.bf16.mxu1 %v2167_v0 }
  0x45   :  { %1867 = vmatpush3.bf16.msra.mxu0 %v1866_v25  ;;  %v1893_v25 = vpack.c.bf16 %v293_v24, %v292_v23  ;;  %v414_v23 = vld [vmem:[#allocation2 + $0x108] sm:$0xff] }
  0x46   :  { %1892 = vmatprep.subr.bf16.mxu0 %v2167_v0 }
  0x47   :  { %1888 = vmatpush3.bf16.msra.mxu1 %v1887_v47  ;;  %v1914_v47 = vpack.c.bf16 %v307_v46, %v306_v45  ;;  %v428_v45 = vld [vmem:[#allocation2 + $0x178] sm:$0xff] }
  0x48   :  { %1520 = vmatmul.mubr.f32.vlgmr.msra.gmra.mrb[0].mxu0 %v2238_v26  ;;  %1889 = vmatprep.subr.bf16.mxu1 %v2167_v0 }
  0x49   :  { %1589 = vmatprep.mubr.msk.f32.mxu0 %vm2168_vm0, %v2169_v1  ;;  %1894 = vmatpush3.bf16.msra.mxu0 %v1893_v25  ;;  %v415_v25 = vld [vmem:[#allocation2 + $0x110] sm:$0xff] }
  0x4a   :  { %1895 = vmatprep.subr.bf16.mxu0 %v2167_v0  ;;  %v1920_v28 = vpack.c.bf16 %v416_v27, %v415_v25  ;;  %v536_v27 = vld [vmem:[#allocation2 + $0x190] sm:$0xff] }
  0x4b   :  { %1891 = vmatpush3.bf16.msra.mxu1 %v1890_v50 }
  0x4c   :  { %1916 = vmatprep.subr.bf16.mxu1 %v2167_v0 }
  0x4d   :  { %1897 = vmatpush3.bf16.msra.mxu0 %v1896_v29  ;;  %v417_v29 = vld [vmem:[#allocation2 + $0x120] sm:$0xff] }
  0x4e   :  { %1898 = vmatprep.subr.bf16.mxu0 %v2167_v0  ;;  %v1923_v31 = vpack.c.bf16 %v418_v30, %v417_v29  ;;  %v538_v29 = vld [vmem:[#allocation2 + $0x1a0] sm:$0xff]  ;;  %v539_v30 = vld [vmem:[#allocation2 + $0x1a8] sm:$0xff] }
  0x51   :  { %1900 = vmatpush3.bf16.msra.mxu0 %v1899_v32  ;;  %v419_v32 = vld [vmem:[#allocation2 + $0x130] sm:$0xff] }
  0x52   :  { %1901 = vmatprep.subr.bf16.mxu0 %v2167_v0  ;;  %v1926_v34 = vpack.c.bf16 %v420_v33, %v419_v32  ;;  %v540_v32 = vld [vmem:[#allocation2 + $0x1b0] sm:$0xff]  ;;  %v541_v33 = vld [vmem:[#allocation2 + $0x1b8] sm:$0xff] }
  0x55   :  { %1903 = vmatpush3.bf16.msra.mxu0 %v1902_v35  ;;  %v421_v35 = vld [vmem:[#allocation2 + $0x140] sm:$0xff] }
  0x56   :  { %1904 = vmatprep.subr.bf16.mxu0 %v2167_v0  ;;  %v1929_v37 = vpack.c.bf16 %v422_v36, %v421_v35  ;;  %v542_v35 = vld [vmem:[#allocation2 + $0x1c0] sm:$0xff]  ;;  %v543_v36 = vld [vmem:[#allocation2 + $0x1c8] sm:$0xff] }
  0x59   :  { %1906 = vmatpush3.bf16.msra.mxu0 %v1905_v38  ;;  %v423_v38 = vld [vmem:[#allocation2 + $0x150] sm:$0xff] }
  0x5a   :  { %1907 = vmatprep.subr.bf16.mxu0 %v2167_v0  ;;  %v1932_v40 = vpack.c.bf16 %v424_v39, %v423_v38  ;;  %v544_v38 = vld [vmem:[#allocation2 + $0x1d0] sm:$0xff]  ;;  %v545_v39 = vld [vmem:[#allocation2 + $0x1d8] sm:$0xff] }
  0x5d   :  { %1909 = vmatpush3.bf16.msra.mxu0 %v1908_v41  ;;  %v425_v41 = vld [vmem:[#allocation2 + $0x160] sm:$0xff] }
  0x5e   :  { %1910 = vmatprep.subr.bf16.mxu0 %v2167_v0  ;;  %v1935_v43 = vpack.c.bf16 %v426_v42, %v425_v41  ;;  %v546_v41 = vld [vmem:[#allocation2 + $0x1e0] sm:$0xff]  ;;  %v547_v42 = vld [vmem:[#allocation2 + $0x1e8] sm:$0xff] }
  0x61   :  { %1912 = vmatpush3.bf16.msra.mxu0 %v1911_v44  ;;  %v427_v44 = vld [vmem:[#allocation2 + $0x170] sm:$0xff] }
  0x62   :  { %1913 = vmatprep.subr.bf16.mxu0 %v2167_v0  ;;  %v1938_v46 = vpack.c.bf16 %v428_v45, %v427_v44  ;;  %v548_v44 = vld [vmem:[#allocation2 + $0x1f0] sm:$0xff]  ;;  %v549_v45 = vld [vmem:[#allocation2 + $0x1f8] sm:$0xff] }
  0x65   :  { %1915 = vmatpush3.bf16.msra.mxu0 %v1914_v47  ;;  %v2310_v47 = vsub.s32 6, %v2252_v52 }
  0x66   :  { %1940 = vmatprep.subr.bf16.mxu0 %v2167_v0 }
 0x11b   :  { %v136_v56 = vpop.f32.mrb[0].mxu0 }
 0x11c   :  { %v137_v57 = vadd.f32 %v136_v56, %v69_v55  ;;  %v1521_v58 = vpop.f32.mrb[1].mxu0 }
 0x11e   :  { %v140_v59 = vmax.f32 %v137_v57, 0.0 }
 0x120   :  { %v141_v60 = vrot.slane %v140_v59, 4 }
 0x122   :  { %v142_v61 = vadd.f32 %v141_v60, %v140_v59 }
 0x124   :  { %v143_v62 = vrot.slane %v142_v61, 2 }
 0x126   :  { %v144_v63 = vadd.f32 %v143_v62, %v142_v61 }
 0x128   :  { %v145_v2 = vrot.slane %v144_v63, 1 }
 0x12a   :  { %v146_v3 = vadd.f32 %v145_v2, %v144_v63 }
 0x12c   :  { %v148_v4 = vmul.f32 0.125, %v146_v3 }
 0x12e   :  { %v149_v5 = vsub.f32 %v140_v59, %v148_v4 }
 0x130   :  { %v150_v6 = vmul.f32 %v149_v5, %v149_v5 }
 0x132   :  { %v151_v7 = vrot.slane %v150_v6, 4 }
 0x134   :  { %v152_v8 = vadd.f32 %v151_v7, %v150_v6 }
 0x136   :  { %v153_v9 = vrot.slane %v152_v8, 2 }
 0x138   :  { %v154_v10 = vadd.f32 %v153_v9, %v152_v8 }
 0x13a   :  { %v155_v11 = vrot.slane %v154_v10, 1 }
 0x13c   :  { %v156_v12 = vadd.f32 %v155_v11, %v154_v10  ;;  %v2290_v11 = vsub.s32 4, %v2252_v52 }
 0x13e   :  { %v157_v13 = vmul.f32 0.125, %v156_v12  ;;  %v2293_v12 = vsub.s32 5, %v2252_v52 }
 0x140   :  { %v158_v14 = vadd.f32 1e-05, %v157_v13  ;;  %v283_v13 = vrot.slane %v2260_v54, %v2290_v11 }
 0x142   :  { %2097 = vrsqrt.f32 %v158_v14 }
 0x14c   :  { %v2098_v18 = vpop.eup %2097 }
 0x14d   :  { %v160_v19 = vmul.f32 %v2098_v18, %v149_v5  ;;  %v288_v18 = vrot.slane %v2260_v54, %v2293_v12 }
 0x14f   :  { %v165_v21 = vmul.f32 %v164_v17, %v160_v19 }
 0x151   :  { %v170_v22 = vadd.f32 %v169_v20, %v165_v21 }
 0x153   :  { %1555 = vmatmul.mubr.f32.vlgmr.msra.gmra.mrb[0].mxu1 %v170_v22  ;;  %v413_v22 = vld [vmem:[#allocation2 + $0x100] sm:$0xff] }
 0x154   :  { %1624 = vmatprep.mubr.msk.f32.mxu1 %vm2168_vm0, %v2169_v1  ;;  %v1917_v24 = vpack.c.bf16 %v414_v23, %v413_v22 }
 0x156   :  { %1918 = vmatpush3.bf16.msra.mxu1 %v1917_v24  ;;  %v535_v24 = vld [vmem:[#allocation2 + $0x188] sm:$0xff] }
 0x157   :  { %1919 = vmatprep.subr.bf16.mxu1 %v2167_v0 }
 0x15a   :  { %1921 = vmatpush3.bf16.msra.mxu1 %v1920_v28 }
 0x15b   :  { %1922 = vmatprep.subr.bf16.mxu1 %v2167_v0 }
 0x15e   :  { %1924 = vmatpush3.bf16.msra.mxu1 %v1923_v31  ;;  %v1947_v31 = vpack.c.bf16 %v539_v30, %v538_v29 }
 0x15f   :  { %1925 = vmatprep.subr.bf16.mxu1 %v2167_v0 }
 0x162   :  { %1927 = vmatpush3.bf16.msra.mxu1 %v1926_v34  ;;  %v1950_v34 = vpack.c.bf16 %v541_v33, %v540_v32 }
 0x163   :  { %1928 = vmatprep.subr.bf16.mxu1 %v2167_v0 }
 0x166   :  { %1930 = vmatpush3.bf16.msra.mxu1 %v1929_v37  ;;  %v1953_v37 = vpack.c.bf16 %v543_v36, %v542_v35 }
 0x167   :  { %1931 = vmatprep.subr.bf16.mxu1 %v2167_v0 }
 0x16a   :  { %1933 = vmatpush3.bf16.msra.mxu1 %v1932_v40  ;;  %v1956_v40 = vpack.c.bf16 %v545_v39, %v544_v38 }
 0x16b   :  { %1934 = vmatprep.subr.bf16.mxu1 %v2167_v0 }
 0x16e   :  { %1936 = vmatpush3.bf16.msra.mxu1 %v1935_v43  ;;  %v1959_v43 = vpack.c.bf16 %v547_v42, %v546_v41 }
 0x16f   :  { %1937 = vmatprep.subr.bf16.mxu1 %v2167_v0 }
 0x172   :  { %1939 = vmatpush3.bf16.msra.mxu1 %v1938_v46  ;;  %v1962_v46 = vpack.c.bf16 %v549_v45, %v548_v44  ;;  %v639_v44 = vld [vmem:[#allocation4 + $0xf0] sm:$0xff]  ;;  %v640_v45 = vld [vmem:[#allocation4 + $0xf8] sm:$0xff] }
 0x173   :  { %1964 = vmatprep.subr.bf16.mxu1 %v2167_v0 }
 0x226   :  { %v257_v50 = vpop.f32.mrb[0].mxu1 }
 0x227   :  { %v258_v51 = vadd.f32 %v257_v50, %v190_v49  ;;  %v1556_v55 = vpop.f32.mrb[1].mxu1  ;;  %v311_v49 = vrot.slane %v2260_v54, %v2310_v47 }
 0x229   :  { %v261_v56 = vrot.slane %v258_v51, 4 }
 0x22b   :  { %v262_v57 = vadd.f32 %v261_v56, %v258_v51 }
 0x22d   :  { %v263_v58 = vrot.slane %v262_v57, 2 }
 0x22f   :  { %v264_v59 = vadd.f32 %v263_v58, %v262_v57 }
 0x231   :  { %v265_v60 = vrot.slane %v264_v59, 1 }
 0x233   :  { %v266_v61 = vadd.f32 %v265_v60, %v264_v59 }
 0x235   :  { %v267_v62 = vmul.f32 0.125, %v266_v61 }
 0x237   :  { %v268_v63 = vsub.f32 %v258_v51, %v267_v62 }
 0x239   :  { %v269_v2 = vmul.f32 %v268_v63, %v268_v63 }
 0x23b   :  { %v270_v3 = vrot.slane %v269_v2, 4 }
 0x23d   :  { %v271_v4 = vadd.f32 %v270_v3, %v269_v2 }
 0x23f   :  { %v272_v5 = vrot.slane %v271_v4, 2 }
 0x241   :  { %v273_v6 = vadd.f32 %v272_v5, %v271_v4 }
 0x243   :  { %v274_v7 = vrot.slane %v273_v6, 1 }
 0x245   :  { %v275_v8 = vadd.f32 %v274_v7, %v273_v6 }
 0x247   :  { %v276_v9 = vmul.f32 0.125, %v275_v8 }
 0x249   :  { %v277_v10 = vadd.f32 1e-05, %v276_v9 }
 0x24b   :  { %2099 = vrsqrt.f32 %v277_v10 }
 0x255   :  { %v2100_v14 = vpop.eup %2099 }
 0x256   :  { %v279_v17 = vmul.f32 %v2100_v14, %v268_v63  ;;  %v2320_v14 = vld [vmem:[%s2437_s3 + $0x8] sm:$0xff] }
 0x258   :  { %v284_v19 = vmul.f32 %v283_v13, %v279_v17  ;;  %v2315_v13 = vsub.s32 7, %v2252_v52  ;;  %v534_v52 = vld [vmem:[#allocation2 + $0x180] sm:$0xff] }
 0x259   :  { %v1941_v25 = vpack.c.bf16 %v535_v24, %v534_v52 }
 0x25a   :  { %v289_v20 = vadd.f32 %v288_v18, %v284_v19  ;;  %v404_v17 = vrot.slane %v2260_v54, %v2315_v13  ;;  %v537_v54 = vld [vmem:[#allocation2 + $0x198] sm:$0xff] }
 0x25b   :  { %v1944_v28 = vpack.c.bf16 %v537_v54, %v536_v27 }
 0x25c   :  { %v290_v21 = vmax.f32 %v289_v20, 0.0  ;;  %v409_v20 = vrot.slane %v2320_v14, %v2255_v53 }
 0x25e   :  { %1590 = vmatmul.mubr.f32.vlgmr.msra.gmra.mrb[2].mxu0 %v290_v21 }
 0x25f   :  { %1659 = vmatprep.mubr.msk.f32.mxu0 %vm2168_vm0, %v2169_v1  ;;  %1942 = vmatpush3.bf16.msra.mxu0 %v1941_v25 }
 0x260   :  { %1943 = vmatprep.subr.bf16.mxu0 %v2167_v0 }
 0x263   :  { %1945 = vmatpush3.bf16.msra.mxu0 %v1944_v28 }
 0x264   :  { %1946 = vmatprep.subr.bf16.mxu0 %v2167_v0 }
 0x267   :  { %1948 = vmatpush3.bf16.msra.mxu0 %v1947_v31 }
 0x268   :  { %1949 = vmatprep.subr.bf16.mxu0 %v2167_v0 }
 0x26b   :  { %1951 = vmatpush3.bf16.msra.mxu0 %v1950_v34 }
 0x26c   :  { %1952 = vmatprep.subr.bf16.mxu0 %v2167_v0 }
 0x26f   :  { %1954 = vmatpush3.bf16.msra.mxu0 %v1953_v37  ;;  %v525_v37 = vrot.slane %v2320_v14, %v2268_v16 }
 0x270   :  { %1955 = vmatprep.subr.bf16.mxu0 %v2167_v0 }
 0x273   :  { %1957 = vmatpush3.bf16.msra.mxu0 %v1956_v40  ;;  %v530_v40 = vrot.slane %v2320_v14, %v2285_v48 }
 0x274   :  { %1958 = vmatprep.subr.bf16.mxu0 %v2167_v0 }
 0x277   :  { %1960 = vmatpush3.bf16.msra.mxu0 %v1959_v43 }
 0x278   :  { %1961 = vmatprep.subr.bf16.mxu0 %v2167_v0 }
 0x27b   :  { %1963 = vmatpush3.bf16.msra.mxu0 %v1962_v46  ;;  %v1986_v46 = vpack.c.bf16 %v640_v45, %v639_v44 }
 0x27c   :  { %1988 = vmatprep.subr.bf16.mxu0 %v2167_v0 }
 0x331   :  { %v378_v50 = vpop.f32.mrb[2].mxu0 }
 0x332   :  { %v379_v51 = vadd.f32 %v378_v50, %v311_v49  ;;  %v1591_v55 = vpop.f32.mrb[3].mxu0  ;;  %v625_v49 = vld [vmem:[#allocation4 + $0x80] sm:$0xff]  ;;  %v626_v50 = vld [vmem:[#allocation4 + $0x88] sm:$0xff] }
 0x333   :  { %v1965_v55 = vpack.c.bf16 %v626_v50, %v625_v49  ;;  %v553_v49 = vrot.slane %v2320_v14, %v2290_v11 }
 0x334   :  { %v382_v56 = vrot.slane %v379_v51, 4 }
 0x336   :  { %v383_v57 = vadd.f32 %v382_v56, %v379_v51  ;;  %v628_v56 = vld [vmem:[#allocation4 + $0x98] sm:$0xff] }
 0x338   :  { %v384_v58 = vrot.slane %v383_v57, 2 }
 0x33a   :  { %v385_v59 = vadd.f32 %v384_v58, %v383_v57  ;;  %v629_v58 = vld [vmem:[#allocation4 + $0xa0] sm:$0xff] }
 0x33c   :  { %v386_v60 = vrot.slane %v385_v59, 1 }
 0x33e   :  { %v387_v61 = vadd.f32 %v386_v60, %v385_v59  ;;  %v630_v59 = vld [vmem:[#allocation4 + $0xa8] sm:$0xff] }
 0x33f   :  { %v1971_v60 = vpack.c.bf16 %v630_v59, %v629_v58 }
 0x340   :  { %v388_v62 = vmul.f32 0.125, %v387_v61  ;;  %v631_v61 = vld [vmem:[#allocation4 + $0xb0] sm:$0xff] }
 0x342   :  { %v389_v63 = vsub.f32 %v379_v51, %v388_v62  ;;  %v627_v51 = vld [vmem:[#allocation4 + $0x90] sm:$0xff]  ;;  %v632_v62 = vld [vmem:[#allocation4 + $0xb8] sm:$0xff] }
 0x343   :  { %v1968_v57 = vpack.c.bf16 %v628_v56, %v627_v51  ;;  %v644_v56 = vrot.slane %v2320_v14, %v2293_v12 }
 0x344   :  { %v390_v2 = vmul.f32 %v389_v63, %v389_v63 }
 0x346   :  { %v391_v3 = vrot.slane %v390_v2, 4 }
 0x348   :  { %v392_v4 = vadd.f32 %v391_v3, %v390_v2  ;;  %v633_v2 = vld [vmem:[#allocation4 + $0xc0] sm:$0xff]  ;;  %v634_v3 = vld [vmem:[#allocation4 + $0xc8] sm:$0xff] }
 0x34a   :  { %v393_v5 = vrot.slane %v392_v4, 2 }
 0x34c   :  { %v394_v6 = vadd.f32 %v393_v5, %v392_v4  ;;  %v1977_v4 = vpack.c.bf16 %v634_v3, %v633_v2  ;;  %v635_v5 = vld [vmem:[#allocation4 + $0xd0] sm:$0xff] }
 0x34e   :  { %v395_v7 = vrot.slane %v394_v6, 1 }
 0x350   :  { %v396_v8 = vadd.f32 %v395_v7, %v394_v6  ;;  %v636_v6 = vld [vmem:[#allocation4 + $0xd8] sm:$0xff] }
 0x351   :  { %v1980_v7 = vpack.c.bf16 %v636_v6, %v635_v5 }
 0x352   :  { %v397_v9 = vmul.f32 0.125, %v396_v8  ;;  %v637_v8 = vld [vmem:[#allocation4 + $0xe0] sm:$0xff] }
 0x354   :  { %v398_v10 = vadd.f32 1e-05, %v397_v9  ;;  %v638_v9 = vld [vmem:[#allocation4 + $0xe8] sm:$0xff] }
 0x356   :  { %2101 = vrsqrt.f32 %v398_v10  ;;  %v1983_v10 = vpack.c.bf16 %v638_v9, %v637_v8  ;;  %v842_v9 = vld [vmem:[#allocation2 + $0x200] sm:$0xff] }
 0x360   :  { %v2102_v18 = vpop.eup %2101 }
 0x361   :  { %v400_v19 = vmul.f32 %v2102_v18, %v389_v63  ;;  %v1974_v63 = vpack.c.bf16 %v632_v62, %v631_v61  ;;  %v729_v62 = vld [vmem:[#allocation4 + $0x100] sm:$0xff] }
 0x363   :  { %v405_v21 = vmul.f32 %v404_v17, %v400_v19  ;;  %v432_v17 = vrot.slane %v2320_v14, %v2265_v15 }
 0x365   :  { %v410_v22 = vadd.f32 %v409_v20, %v405_v21 }
 0x367   :  { %v411_v23 = vmax.f32 %v410_v22, 0.0 }
 0x369   :  { %1625 = vmatmul.mubr.f32.vlgmr.msra.gmra.mrb[2].mxu1 %v411_v23 }
 0x36a   :  { %1694 = vmatprep.mubr.msk.f32.mxu1 %vm2168_vm0, %v2169_v1  ;;  %1966 = vmatpush3.bf16.msra.mxu1 %v1965_v55 }
 0x36b   :  { %1967 = vmatprep.subr.bf16.mxu1 %v2167_v0 }
 0x36e   :  { %1969 = vmatpush3.bf16.msra.mxu1 %v1968_v57 }
 0x36f   :  { %1970 = vmatprep.subr.bf16.mxu1 %v2167_v0 }
 0x372   :  { %1972 = vmatpush3.bf16.msra.mxu1 %v1971_v60 }
 0x373   :  { %1973 = vmatprep.subr.bf16.mxu1 %v2167_v0 }
 0x376   :  { %1975 = vmatpush3.bf16.msra.mxu1 %v1974_v63  ;;  %v730_v63 = vld [vmem:[#allocation4 + $0x108] sm:$0xff] }
 0x377   :  { %1976 = vmatprep.subr.bf16.mxu1 %v2167_v0  ;;  %v1989_v2 = vpack.c.bf16 %v730_v63, %v729_v62 }
 0x37a   :  { %1978 = vmatpush3.bf16.msra.mxu1 %v1977_v4 }
 0x37b   :  { %1979 = vmatprep.subr.bf16.mxu1 %v2167_v0 }
 0x37e   :  { %1981 = vmatpush3.bf16.msra.mxu1 %v1980_v7 }
 0x37f   :  { %1982 = vmatprep.subr.bf16.mxu1 %v2167_v0 }
 0x382   :  { %1984 = vmatpush3.bf16.msra.mxu1 %v1983_v10  ;;  %v843_v10 = vld [vmem:[#allocation2 + $0x208] sm:$0xff] }
 0x383   :  { %1985 = vmatprep.subr.bf16.mxu1 %v2167_v0 }
 0x386   :  { %1987 = vmatpush3.bf16.msra.mxu1 %v1986_v46 }
 0x387   :  { %1991 = vmatprep.subr.bf16.mxu1 %v2167_v0 }
 0x43c   :  { %v499_v18 = vpop.f32.mrb[2].mxu1 }
 0x43d   :  { %v500_v19 = vadd.f32 %v499_v18, %v432_v17  ;;  %v1626_v20 = vpop.f32.mrb[3].mxu1  ;;  %v1992_v17 = vpack.c.bf16 %v843_v10, %v842_v9  ;;  %v845_v18 = vld [vmem:[#allocation2 + $0x218] sm:$0xff]  ;;  %v963_v10 = vld [vmem:[#allocation2 + $0x280] sm:$0xff] }
 0x43e   :  { %v846_v20 = vld [vmem:[#allocation2 + $0x220] sm:$0xff] }
 0x43f   :  { %v503_v21 = vrot.slane %v500_v19, 4 }
 0x441   :  { %v504_v22 = vadd.f32 %v503_v21, %v500_v19  ;;  %v847_v21 = vld [vmem:[#allocation2 + $0x228] sm:$0xff] }
 0x443   :  { %v505_v23 = vrot.slane %v504_v22, 2 }
 0x445   :  { %v506_v52 = vadd.f32 %v505_v23, %v504_v22  ;;  %v1998_v22 = vpack.c.bf16 %v847_v21, %v846_v20  ;;  %v848_v23 = vld [vmem:[#allocation2 + $0x230] sm:$0xff]  ;;  %v967_v20 = vld [vmem:[#allocation2 + $0x2a0] sm:$0xff]  ;;  %v968_v21 = vld [vmem:[#allocation2 + $0x2a8] sm:$0xff] }
 0x447   :  { %v507_v24 = vrot.slane %v506_v52, 1 }
 0x449   :  { %v508_v25 = vadd.f32 %v507_v24, %v506_v52  ;;  %v849_v52 = vld [vmem:[#allocation2 + $0x238] sm:$0xff] }
 0x44a   :  { %v2001_v24 = vpack.c.bf16 %v849_v52, %v848_v23  ;;  %v969_v23 = vld [vmem:[#allocation2 + $0x2b0] sm:$0xff]  ;;  %v970_v52 = vld [vmem:[#allocation2 + $0x2b8] sm:$0xff] }
 0x44b   :  { %v509_v27 = vmul.f32 0.125, %v508_v25  ;;  %v850_v25 = vld [vmem:[#allocation2 + $0x240] sm:$0xff] }
 0x44d   :  { %v510_v54 = vsub.f32 %v500_v19, %v509_v27  ;;  %v851_v27 = vld [vmem:[#allocation2 + $0x248] sm:$0xff] }
 0x44f   :  { %v511_v28 = vmul.f32 %v510_v54, %v510_v54 }
 0x451   :  { %v512_v29 = vrot.slane %v511_v28, 4 }
 0x453   :  { %v513_v30 = vadd.f32 %v512_v29, %v511_v28  ;;  %v852_v28 = vld [vmem:[#allocation2 + $0x250] sm:$0xff]  ;;  %v853_v29 = vld [vmem:[#allocation2 + $0x258] sm:$0xff] }
 0x455   :  { %v514_v31 = vrot.slane %v513_v30, 2 }
 0x457   :  { %v515_v32 = vadd.f32 %v514_v31, %v513_v30  ;;  %v2007_v30 = vpack.c.bf16 %v853_v29, %v852_v28  ;;  %v854_v31 = vld [vmem:[#allocation2 + $0x260] sm:$0xff]  ;;  %v973_v28 = vld [vmem:[#allocation2 + $0x2d0] sm:$0xff]  ;;  %v974_v29 = vld [vmem:[#allocation2 + $0x2d8] sm:$0xff] }
 0x459   :  { %v516_v33 = vrot.slane %v515_v32, 1 }
 0x45b   :  { %v517_v34 = vadd.f32 %v516_v33, %v515_v32  ;;  %v855_v32 = vld [vmem:[#allocation2 + $0x268] sm:$0xff] }
 0x45c   :  { %v2010_v33 = vpack.c.bf16 %v855_v32, %v854_v31  ;;  %v975_v31 = vld [vmem:[#allocation2 + $0x2e0] sm:$0xff]  ;;  %v976_v32 = vld [vmem:[#allocation2 + $0x2e8] sm:$0xff] }
 0x45d   :  { %v518_v35 = vmul.f32 0.125, %v517_v34  ;;  %v856_v34 = vld [vmem:[#allocation2 + $0x270] sm:$0xff] }
 0x45f   :  { %v519_v36 = vadd.f32 1e-05, %v518_v35  ;;  %v857_v35 = vld [vmem:[#allocation2 + $0x278] sm:$0xff] }
 0x461   :  { %2103 = vrsqrt.f32 %v519_v36  ;;  %v2013_v36 = vpack.c.bf16 %v857_v35, %v856_v34  ;;  %v977_v34 = vld [vmem:[#allocation2 + $0x2f0] sm:$0xff]  ;;  %v978_v35 = vld [vmem:[#allocation2 + $0x2f8] sm:$0xff] }
 0x46b   :  { %v2104_v38 = vpop.eup %2103 }
 0x46c   :  { %v521_v39 = vmul.f32 %v2104_v38, %v510_v54  ;;  %v2004_v54 = vpack.c.bf16 %v851_v27, %v850_v25  ;;  %v971_v25 = vld [vmem:[#allocation2 + $0x2c0] sm:$0xff]  ;;  %v972_v27 = vld [vmem:[#allocation2 + $0x2c8] sm:$0xff] }
 0x46e   :  { %v526_v41 = vmul.f32 %v525_v37, %v521_v39  ;;  %v734_v37 = vrot.slane %v2320_v14, %v2310_v47 }
 0x470   :  { %v531_v42 = vadd.f32 %v530_v40, %v526_v41 }
 0x472   :  { %v532_v43 = vmax.f32 %v531_v42, 0.0 }
 0x474   :  { %1660 = vmatmul.mubr.f32.vlgmr.msra.gmra.mrb[4].mxu0 %v532_v43 }
 0x475   :  { %1701 = vmatprep.mubr.msk.f32.mxu0 %vm2168_vm0, %v2169_v1  ;;  %1990 = vmatpush3.bf16.msra.mxu0 %v1989_v2  ;;  %v2378_v2 = vld [vmem:[%s2437_s3 + $0x10] sm:$0xff] }
 0x476   :  { %2015 = vmatprep.subr.bf16.mxu0 %v2167_v0 }
 0x547   :  { %v620_v50 = vpop.f32.mrb[4].mxu0 }
 0x548   :  { %v621_v51 = vadd.f32 %v620_v50, %v553_v49  ;;  %v1661_v55 = vpop.f32.mrb[5].mxu0 }
 0x54a   :  { %1695 = vmatmul.mubr.f32.vlgmr.msra.gmra.mrb[4].mxu1 %v621_v51 }
 0x54b   :  { %1736 = vmatprep.mubr.msk.f32.mxu1 %vm2168_vm0, %v2169_v1  ;;  %1993 = vmatpush3.bf16.msra.mxu1 %v1992_v17  ;;  %v964_v17 = vld [vmem:[#allocation2 + $0x288] sm:$0xff] }
 0x54c   :  { %1994 = vmatprep.subr.bf16.mxu1 %v2167_v0 }
 0x61d   :  { %v711_v57 = vpop.f32.mrb[4].mxu1 }
 0x61e   :  { %v712_v58 = vadd.f32 %v711_v57, %v644_v56  ;;  %v1696_v59 = vpop.f32.mrb[5].mxu1 }
 0x620   :  { %v715_v60 = vmul.f32 0.5, %v712_v58 }
 0x622   :  { %v716_v61 = vmul.f32 1.442695, %v715_v60 }
 0x624   :  { %2105 = vpow2.f32 %v716_v61 }
 0x62e   :  { %v2106_v3 = vpop.eup %2105 }
 0x62f   :  { %719 = vrot.lane.b32.xlu0 %v2106_v3, %s2170_s18  ;;  %v834_v3 = vrot.slane %v2320_v14, %v2315_v13 }
 0x633   :  { %724 = vrot.lane.b32.xlu0 %v712_v58, %s2171_s19 }
 0x6a1   :  { %v720_v4 = vpop.permute.xlu0 %719 }
 0x6a2   :  { %v722_v5 = vmul.f32 %v720_v4, %v2238_v26  ;;  %v844_v26 = vld [vmem:[#allocation2 + $0x210] sm:$0xff] }
 0x6a3   :  { %v1995_v19 = vpack.c.bf16 %v845_v18, %v844_v26  ;;  %v2016_v26 = vpack.c.bf16 %v964_v17, %v963_v10  ;;  %v965_v18 = vld [vmem:[#allocation2 + $0x290] sm:$0xff]  ;;  %v1084_v10 = vld [vmem:[#allocation2 + $0x300] sm:$0xff]  ;;  %v1085_v17 = vld [vmem:[#allocation2 + $0x308] sm:$0xff] }
 0x6a5   :  { %v725_v6 = vpop.permute.xlu0 %724  ;;  %1996 = vmatpush3.bf16.msra.mxu1 %v1995_v19  ;;  %v966_v19 = vld [vmem:[#allocation2 + $0x298] sm:$0xff] }
 0x6a6   :  { %v2360_v7 = vadd.f32 %v725_v6, %v722_v5  ;;  %1997 = vmatprep.subr.bf16.mxu1 %v2167_v0  ;;  %v839_v6 = vrot.slane %v2378_v2, %v2255_v53  ;;  %v2019_v14 = vpack.c.bf16 %v966_v19, %v965_v18  ;;  %v1086_v18 = vld [vmem:[#allocation2 + $0x310] sm:$0xff]  ;;  %v1087_v19 = vld [vmem:[#allocation2 + $0x318] sm:$0xff] }
 0x6a8   :  { %736 = vrot.lane.b32.xlu1 %v2360_v7, %s2171_s19 }
 0x6a9   :  { %1999 = vmatpush3.bf16.msra.mxu1 %v1998_v22  ;;  %v2022_v22 = vpack.c.bf16 %v968_v21, %v967_v20  ;;  %v1089_v20 = vld [vmem:[#allocation2 + $0x328] sm:$0xff] }
 0x6aa   :  { %2000 = vmatprep.subr.bf16.mxu1 %v2167_v0 }
 0x6ac   :  { %1295 = vrot.lane.b32.xlu1 %v712_v58, %s2172_s20 }
 0x6ad   :  { %2002 = vmatpush3.bf16.msra.mxu1 %v2001_v24  ;;  %v2025_v24 = vpack.c.bf16 %v970_v52, %v969_v23  ;;  %v1092_v52 = vld [vmem:[#allocation2 + $0x340] sm:$0xff] }
 0x6ae   :  { %2003 = vmatprep.subr.bf16.mxu1 %v2167_v0 }
 0x6b1   :  { %2005 = vmatpush3.bf16.msra.mxu1 %v2004_v54  ;;  %v2028_v54 = vpack.c.bf16 %v972_v27, %v971_v25  ;;  %v1094_v27 = vld [vmem:[#allocation2 + $0x350] sm:$0xff] }
 0x6b2   :  { %2006 = vmatprep.subr.bf16.mxu1 %v2167_v0 }
 0x6b5   :  { %2008 = vmatpush3.bf16.msra.mxu1 %v2007_v30  ;;  %v2031_v30 = vpack.c.bf16 %v974_v29, %v973_v28  ;;  %v1096_v29 = vld [vmem:[#allocation2 + $0x360] sm:$0xff] }
 0x6b6   :  { %2009 = vmatprep.subr.bf16.mxu1 %v2167_v0 }
 0x6b9   :  { %2011 = vmatpush3.bf16.msra.mxu1 %v2010_v33  ;;  %v2034_v33 = vpack.c.bf16 %v976_v32, %v975_v31  ;;  %v1098_v32 = vld [vmem:[#allocation2 + $0x370] sm:$0xff] }
 0x6ba   :  { %2012 = vmatprep.subr.bf16.mxu1 %v2167_v0 }
 0x6bd   :  { %2014 = vmatpush3.bf16.msra.mxu1 %v2013_v36  ;;  %v2037_v36 = vpack.c.bf16 %v978_v35, %v977_v34  ;;  %v982_v35 = vrot.slane %v2378_v2, %v2290_v11 }
 0x6be   :  { %2039 = vmatprep.subr.bf16.mxu1 %v2167_v0 }
 0x71a   :  { %v737_v8 = vpop.permute.xlu1 %736 }
 0x71b   :  { %1702 = vmatmul.mubr.msk.f32.vlgmr.msra.gmra.mrb[6].mxu0 %vm738_vm1, %v737_v8 }
 0x71c   :  { %1771 = vmatprep.mubr.msk.f32.mxu0 %vm2168_vm0, %v2169_v1  ;;  %2017 = vmatpush3.bf16.msra.mxu0 %v2016_v26  ;;  %v2040_v26 = vpack.c.bf16 %v1085_v17, %v1084_v10  ;;  %v1207_v10 = vld [vmem:[#allocation4 + $0x190] sm:$0xff]  ;;  %v1208_v17 = vld [vmem:[#allocation4 + $0x198] sm:$0xff] }
 0x71d   :  { %2018 = vmatprep.subr.bf16.mxu0 %v2167_v0 }
 0x720   :  { %2020 = vmatpush3.bf16.msra.mxu0 %v2019_v14  ;;  %v2043_v14 = vpack.c.bf16 %v1087_v19, %v1086_v18  ;;  %v1210_v18 = vld [vmem:[#allocation4 + $0x1a8] sm:$0xff] }
 0x721   :  { %2021 = vmatprep.subr.bf16.mxu0 %v2167_v0 }
 0x724   :  { %2023 = vmatpush3.bf16.msra.mxu0 %v2022_v22  ;;  %v1090_v22 = vld [vmem:[#allocation2 + $0x330] sm:$0xff] }
 0x725   :  { %2024 = vmatprep.subr.bf16.mxu0 %v2167_v0 }
 0x728   :  { %2026 = vmatpush3.bf16.msra.mxu0 %v2025_v24  ;;  %v1093_v24 = vld [vmem:[#allocation2 + $0x348] sm:$0xff] }
 0x729   :  { %2027 = vmatprep.subr.bf16.mxu0 %v2167_v0  ;;  %v2052_v25 = vpack.c.bf16 %v1093_v24, %v1092_v52  ;;  %v1217_v24 = vld [vmem:[#allocation4 + $0x1e0] sm:$0xff] }
 0x72c   :  { %2029 = vmatpush3.bf16.msra.mxu0 %v2028_v54  ;;  %v1095_v54 = vld [vmem:[#allocation2 + $0x358] sm:$0xff] }
 0x72d   :  { %2030 = vmatprep.subr.bf16.mxu0 %v2167_v0  ;;  %v2055_v28 = vpack.c.bf16 %v1095_v54, %v1094_v27  ;;  %v1219_v54 = vld [vmem:[#allocation4 + $0x1f0] sm:$0xff] }
 0x730   :  { %2032 = vmatpush3.bf16.msra.mxu0 %v2031_v30  ;;  %v1097_v30 = vld [vmem:[#allocation2 + $0x368] sm:$0xff] }
 0x731   :  { %2033 = vmatprep.subr.bf16.mxu0 %v2167_v0  ;;  %v2058_v31 = vpack.c.bf16 %v1097_v30, %v1096_v29  ;;  %v1103_v30 = vrot.slane %v2378_v2, %v2315_v13 }
 0x734   :  { %2035 = vmatpush3.bf16.msra.mxu0 %v2034_v33  ;;  %v1099_v33 = vld [vmem:[#allocation2 + $0x378] sm:$0xff] }
 0x735   :  { %2036 = vmatprep.subr.bf16.mxu0 %v2167_v0  ;;  %v2061_v34 = vpack.c.bf16 %v1099_v33, %v1098_v32 }
 0x738   :  { %2038 = vmatpush3.bf16.msra.mxu0 %v2037_v36 }
 0x739   :  { %2063 = vmatprep.subr.bf16.mxu0 %v2167_v0 }
 0x7ee   :  { %v807_v38 = vpop.f32.mrb[6].mxu0 }
 0x7ef   :  { %v808_v39 = vadd.f32 %v807_v38, %v734_v37  ;;  %v1703_v40 = vpop.f32.mrb[7].mxu0  ;;  %v861_v37 = vrot.slane %v2378_v2, %v2265_v15 }
 0x7f1   :  { %v811_v41 = vmax.f32 %v808_v39, 0.0 }
 0x7f3   :  { %v812_v42 = vrot.slane %v811_v41, 4 }
 0x7f5   :  { %v813_v43 = vadd.f32 %v812_v42, %v811_v41 }
 0x7f7   :  { %v814_v44 = vrot.slane %v813_v43, 2 }
 0x7f9   :  { %v815_v45 = vadd.f32 %v814_v44, %v813_v43 }
 0x7fb   :  { %v816_v46 = vrot.slane %v815_v45, 1 }
 0x7fd   :  { %v817_v49 = vadd.f32 %v816_v46, %v815_v45 }
 0x7ff   :  { %v818_v50 = vmul.f32 0.125, %v817_v49 }
 0x801   :  { %v819_v51 = vsub.f32 %v811_v41, %v818_v50 }
 0x803   :  { %v820_v55 = vmul.f32 %v819_v51, %v819_v51 }
 0x805   :  { %v821_v56 = vrot.slane %v820_v55, 4 }
 0x807   :  { %v822_v57 = vadd.f32 %v821_v56, %v820_v55 }
 0x809   :  { %v823_v58 = vrot.slane %v822_v57, 2 }
 0x80b   :  { %v824_v59 = vadd.f32 %v823_v58, %v822_v57 }
 0x80d   :  { %v825_v60 = vrot.slane %v824_v59, 1 }
 0x80f   :  { %v826_v61 = vadd.f32 %v825_v60, %v824_v59 }
 0x811   :  { %v827_v62 = vmul.f32 0.125, %v826_v61 }
 0x813   :  { %v828_v63 = vadd.f32 1e-05, %v827_v62 }
 0x815   :  { %2107 = vrsqrt.f32 %v828_v63  ;;  %v954_v63 = vrot.slane %v2378_v2, %v2268_v16 }
 0x81f   :  { %v2108_v4 = vpop.eup %2107 }
 0x820   :  { %v830_v5 = vmul.f32 %v2108_v4, %v819_v51 }
 0x822   :  { %v835_v8 = vmul.f32 %v834_v3, %v830_v5  ;;  %v959_v5 = vrot.slane %v2378_v2, %v2285_v48  ;;  %v1088_v48 = vld [vmem:[#allocation2 + $0x320] sm:$0xff] }
 0x823   :  { %v2046_v21 = vpack.c.bf16 %v1089_v20, %v1088_v48  ;;  %v1213_v20 = vld [vmem:[#allocation4 + $0x1c0] sm:$0xff] }
 0x824   :  { %v840_v9 = vadd.f32 %v839_v6, %v835_v8 }
 0x826   :  { %1737 = vmatmul.mubr.f32.vlgmr.msra.gmra.mrb[6].mxu1 %v840_v9 }
 0x827   :  { %1806 = vmatprep.mubr.msk.f32.mxu1 %vm2168_vm0, %v2169_v1  ;;  %2041 = vmatpush3.bf16.msra.mxu1 %v2040_v26  ;;  %v2067_v26 = vpack.c.bf16 %v1208_v17, %v1207_v10 }
 0x828   :  { %2042 = vmatprep.subr.bf16.mxu1 %v2167_v0 }
 0x82b   :  { %2044 = vmatpush3.bf16.msra.mxu1 %v2043_v14  ;;  %v1212_v14 = vld [vmem:[#allocation4 + $0x1b8] sm:$0xff] }
 0x82c   :  { %2045 = vmatprep.subr.bf16.mxu1 %v2167_v0 }
 0x82f   :  { %2047 = vmatpush3.bf16.msra.mxu1 %v2046_v21  ;;  %v1214_v21 = vld [vmem:[#allocation4 + $0x1c8] sm:$0xff] }
 0x830   :  { %2048 = vmatprep.subr.bf16.mxu1 %v2167_v0 }
 0x8f9   :  { %v928_v38 = vpop.f32.mrb[6].mxu1 }
 0x8fa   :  { %v929_v39 = vadd.f32 %v928_v38, %v861_v37  ;;  %v1738_v40 = vpop.f32.mrb[7].mxu1 }
 0x8fc   :  { %v932_v41 = vrot.slane %v929_v39, 4 }
 0x8fe   :  { %v933_v42 = vadd.f32 %v932_v41, %v929_v39 }
 0x900   :  { %v934_v43 = vrot.slane %v933_v42, 2 }
 0x902   :  { %v935_v44 = vadd.f32 %v934_v43, %v933_v42 }
 0x904   :  { %v936_v45 = vrot.slane %v935_v44, 1 }
 0x906   :  { %v937_v46 = vadd.f32 %v936_v45, %v935_v44 }
 0x908   :  { %v938_v49 = vmul.f32 0.125, %v937_v46 }
 0x90a   :  { %v939_v50 = vsub.f32 %v929_v39, %v938_v49 }
 0x90c   :  { %v940_v51 = vmul.f32 %v939_v50, %v939_v50 }
 0x90e   :  { %v941_v55 = vrot.slane %v940_v51, 4 }
 0x910   :  { %v942_v56 = vadd.f32 %v941_v55, %v940_v51 }
 0x912   :  { %v943_v57 = vrot.slane %v942_v56, 2 }
 0x914   :  { %v944_v58 = vadd.f32 %v943_v57, %v942_v56 }
 0x916   :  { %v945_v59 = vrot.slane %v944_v58, 1 }
 0x918   :  { %v946_v60 = vadd.f32 %v945_v59, %v944_v58 }
 0x91a   :  { %v947_v61 = vmul.f32 0.125, %v946_v60  ;;  %v1075_v60 = vrot.slane %v2378_v2, %v2293_v12  ;;  %v1209_v12 = vld [vmem:[#allocation4 + $0x1a0] sm:$0xff] }
 0x91b   :  { %v2070_v19 = vpack.c.bf16 %v1210_v18, %v1209_v12 }
 0x91c   :  { %v948_v62 = vadd.f32 1e-05, %v947_v61 }
 0x91e   :  { %2109 = vrsqrt.f32 %v948_v62 }
 0x928   :  { %v2110_v3 = vpop.eup %2109 }
 0x929   :  { %v950_v4 = vmul.f32 %v2110_v3, %v939_v50 }
 0x92b   :  { %v955_v6 = vmul.f32 %v954_v63, %v950_v4  ;;  %v1080_v63 = vrot.slane %v2378_v2, %v2310_v47  ;;  %v1211_v47 = vld [vmem:[#allocation4 + $0x1b0] sm:$0xff]  ;;  %v48_v2 = vld [vmem:[%s2437_s3 + $0x18] sm:$0xff] }
 0x92c   :  { %v2073_v48 = vpack.c.bf16 %v1212_v14, %v1211_v47 }
 0x92d   :  { %v960_v8 = vadd.f32 %v959_v5, %v955_v6  ;;  %v1205_v6 = vld [vmem:[#allocation4 + $0x180] sm:$0xff] }
 0x92f   :  { %v961_v9 = vmax.f32 %v960_v8, 0.0  ;;  %v1206_v8 = vld [vmem:[#allocation4 + $0x188] sm:$0xff] }
 0x931   :  { %1772 = vmatmul.mubr.f32.vlgmr.msra.gmra.mrb[8].mxu0 %v961_v9  ;;  %v2064_v9 = vpack.c.bf16 %v1206_v8, %v1205_v6 }
 0x932   :  { %1841 = vmatprep.mubr.msk.f32.mxu0 %vm2168_vm0, %v2169_v1  ;;  %v1091_v1 = vld [vmem:[#allocation2 + $0x338] sm:$0xff] }
 0x933   :  { %v2049_v23 = vpack.c.bf16 %v1091_v1, %v1090_v22  ;;  %2065 = vmatpush3.bf16.msra.mxu0 %v2064_v9  ;;  %v2076_v22 = vpack.c.bf16 %v1214_v21, %v1213_v20  ;;  %v1215_v1 = vld [vmem:[#allocation4 + $0x1d0] sm:$0xff] }
 0x934   :  { %2066 = vmatprep.subr.bf16.mxu0 %v2167_v0 }
 0x935   :  { %2050 = vmatpush3.bf16.msra.mxu1 %v2049_v23  ;;  %v1216_v23 = vld [vmem:[#allocation4 + $0x1d8] sm:$0xff] }
 0x936   :  { %2051 = vmatprep.subr.bf16.mxu1 %v2167_v0  ;;  %v2079_v52 = vpack.c.bf16 %v1216_v23, %v1215_v1 }
 0x937   :  { %2068 = vmatpush3.bf16.msra.mxu0 %v2067_v26 }
 0x938   :  { %2069 = vmatprep.subr.bf16.mxu0 %v2167_v0 }
 0x939   :  { %2053 = vmatpush3.bf16.msra.mxu1 %v2052_v25  ;;  %v1218_v25 = vld [vmem:[#allocation4 + $0x1e8] sm:$0xff] }
 0x93a   :  { %2054 = vmatprep.subr.bf16.mxu1 %v2167_v0  ;;  %v2082_v27 = vpack.c.bf16 %v1218_v25, %v1217_v24 }
 0x93b   :  { %2071 = vmatpush3.bf16.msra.mxu0 %v2070_v19 }
 0x93c   :  { %2072 = vmatprep.subr.bf16.mxu0 %v2167_v0 }
 0x93d   :  { %2056 = vmatpush3.bf16.msra.mxu1 %v2055_v28  ;;  %v1220_v28 = vld [vmem:[#allocation4 + $0x1f8] sm:$0xff] }
 0x93e   :  { %2057 = vmatprep.subr.bf16.mxu1 %v2167_v0  ;;  %v2085_v29 = vpack.c.bf16 %v1220_v28, %v1219_v54 }
 0x93f   :  { %2074 = vmatpush3.bf16.msra.mxu0 %v2073_v48 }
 0x940   :  { %2075 = vmatprep.subr.bf16.mxu0 %v2167_v0 }
 0x941   :  { %2059 = vmatpush3.bf16.msra.mxu1 %v2058_v31 }
 0x942   :  { %2060 = vmatprep.subr.bf16.mxu1 %v2167_v0 }
 0x943   :  { %2077 = vmatpush3.bf16.msra.mxu0 %v2076_v22 }
 0x944   :  { %2078 = vmatprep.subr.bf16.mxu0 %v2167_v0 }
 0x945   :  { %2062 = vmatpush3.bf16.msra.mxu1 %v2061_v34 }
 0x947   :  { %2080 = vmatpush3.bf16.msra.mxu0 %v2079_v52 }
 0x948   :  { %2081 = vmatprep.subr.bf16.mxu0 %v2167_v0 }
 0x94b   :  { %2083 = vmatpush3.bf16.msra.mxu0 %v2082_v27 }
 0x94c   :  { %2084 = vmatprep.subr.bf16.mxu0 %v2167_v0 }
 0x94f   :  { %2086 = vmatpush3.bf16.msra.mxu0 %v2085_v29 }
 0xa04   :  { %v1049_v36 = vpop.f32.mrb[8].mxu0 }
 0xa05   :  { %v1050_v37 = vadd.f32 %v1049_v36, %v982_v35  ;;  %v1773_v38 = vpop.f32.mrb[9].mxu0 }
 0xa07   :  { %v1053_v39 = vrot.slane %v1050_v37, 4 }
 0xa09   :  { %v1054_v40 = vadd.f32 %v1053_v39, %v1050_v37 }
 0xa0b   :  { %v1055_v41 = vrot.slane %v1054_v40, 2 }
 0xa0d   :  { %v1056_v42 = vadd.f32 %v1055_v41, %v1054_v40 }
 0xa0f   :  { %v1057_v43 = vrot.slane %v1056_v42, 1 }
 0xa11   :  { %v1058_v44 = vadd.f32 %v1057_v43, %v1056_v42 }
 0xa13   :  { %v1059_v45 = vmul.f32 0.125, %v1058_v44 }
 0xa15   :  { %v1060_v46 = vsub.f32 %v1050_v37, %v1059_v45 }
 0xa17   :  { %v1061_v49 = vmul.f32 %v1060_v46, %v1060_v46 }
 0xa19   :  { %v1062_v50 = vrot.slane %v1061_v49, 4 }
 0xa1b   :  { %v1063_v51 = vadd.f32 %v1062_v50, %v1061_v49 }
 0xa1d   :  { %v1064_v55 = vrot.slane %v1063_v51, 2 }
 0xa1f   :  { %v1065_v56 = vadd.f32 %v1064_v55, %v1063_v51  ;;  %v1196_v51 = vrot.slane %v48_v2, %v2255_v53 }
 0xa21   :  { %v1066_v57 = vrot.slane %v1065_v56, 1 }
 0xa23   :  { %v1067_v58 = vadd.f32 %v1066_v57, %v1065_v56  ;;  %v1201_v57 = vrot.slane %v48_v2, %v2265_v15 }
 0xa25   :  { %v1068_v59 = vmul.f32 0.125, %v1067_v58 }
 0xa27   :  { %v1069_v11 = vadd.f32 1e-05, %v1068_v59 }
 0xa29   :  { %2111 = vrsqrt.f32 %v1069_v11 }
 0xa33   :  { %v2112_v61 = vpop.eup %2111 }
 0xa34   :  { %v1071_v62 = vmul.f32 %v2112_v61, %v1060_v46 }
 0xa36   :  { %v1076_v3 = vmul.f32 %v1075_v60, %v1071_v62  ;;  %v1224_v60 = vrot.slane %v48_v2, %v2268_v16 }
 0xa38   :  { %v1081_v4 = vadd.f32 %v1080_v63, %v1076_v3  ;;  %v1296_v3 = vpop.permute.xlu1 %1295 }
 0xa3a   :  { %v1082_v5 = vmax.f32 %v1081_v4, 0.0 }
 0xa3c   :  { %1807 = vmatmul.mubr.f32.vlgmr.msra.gmra.mrb[8].mxu1 %v1082_v5 }
 0xb0f   :  { %v1170_v31 = vpop.f32.mrb[8].mxu1 }
 0xb10   :  { %v1171_v32 = vadd.f32 %v1170_v31, %v1103_v30  ;;  %v1808_v33 = vpop.f32.mrb[9].mxu1 }
 0xb12   :  { %v1174_v34 = vrot.slane %v1171_v32, 4 }
 0xb14   :  { %v1175_v35 = vadd.f32 %v1174_v34, %v1171_v32 }
 0xb16   :  { %v1176_v36 = vrot.slane %v1175_v35, 2 }
 0xb18   :  { %v1177_v37 = vadd.f32 %v1176_v36, %v1175_v35 }
 0xb1a   :  { %v1178_v38 = vrot.slane %v1177_v37, 1 }
 0xb1c   :  { %v1179_v39 = vadd.f32 %v1178_v38, %v1177_v37 }
 0xb1e   :  { %v1180_v40 = vmul.f32 0.125, %v1179_v39 }
 0xb20   :  { %v1181_v41 = vsub.f32 %v1171_v32, %v1180_v40 }
 0xb22   :  { %v1182_v42 = vmul.f32 %v1181_v41, %v1181_v41 }
 0xb24   :  { %v1183_v0 = vrot.slane %v1182_v42, 4 }
 0xb26   :  { %v1184_v43 = vadd.f32 %v1183_v0, %v1182_v42 }
 0xb28   :  { %v1185_v44 = vrot.slane %v1184_v43, 2 }
 0xb2a   :  { %v1186_v45 = vadd.f32 %v1185_v44, %v1184_v43 }
 0xb2c   :  { %v1187_v46 = vrot.slane %v1186_v45, 1 }
 0xb2e   :  { %v1188_v49 = vadd.f32 %v1187_v46, %v1186_v45 }
 0xb30   :  { %v1189_v50 = vmul.f32 0.125, %v1188_v49 }
 0xb32   :  { %v1190_v13 = vadd.f32 1e-05, %v1189_v50 }
 0xb34   :  { %2113 = vrsqrt.f32 %v1190_v13 }
 0xb3e   :  { %v2114_v55 = vpop.eup %2113 }
 0xb3f   :  { %v1192_v56 = vmul.f32 %v2114_v55, %v1181_v41 }
 0xb41   :  { %v1197_v58 = vmul.f32 %v1196_v51, %v1192_v56 }
 0xb43   :  { %v1202_v59 = vadd.f32 %v1201_v57, %v1197_v58 }
 0xb45   :  { %v1203_v11 = vmax.f32 %v1202_v59, 0.0 }
 0xb47   :  { %1842 = vmatmul.mubr.f32.vlgmr.msra.gmra.mrb[10].mxu0 %v1203_v11 }
 0xc1a   :  { %v1291_v61 = vpop.f32.mrb[10].mxu0 }
 0xc1b   :  { %v1292_v62 = vadd.f32 %v1291_v61, %v1224_v60  ;;  %v1843_v63 = vpop.f32.mrb[11].mxu0 }
 0xc1d   :  { %v1299_v4 = vsel %vm1298_vm2, %v1292_v62, %v2360_v7 }
 0xc1e   :  { %v1301_v53 = vsel %vm1300_vm3, %v1299_v4, %v1296_v3 }
 0xc1f   :  { %v1303_v5 = vsel %vm1302_vm4, %v1301_v53, %v1296_v3 }
 0xc20   :  { %v1305_v6 = vsel %vm1304_vm5, %v1303_v5, 0.0 }
 0xc21   :  { %1306 = vst [vmem:[%s2438_s4] sm:$0xff] %v1305_v6 }
 0xc22   :  { %1311 = vsyncpa [#allocation3], 1 }
 0xc23   :  { %1312 = vsyncpa [#allocation5], 1 }

</bundles_post_ra>
